<compile_context>
chip_gen: v6e
topology: v6e:2x2x1
jax: 0.10.0
libtpu: 0.0.40
codegen_flags: <defaults>
</compile_context>

<pallas_src>
import functools

import jax
import jax.numpy as jnp
from jax import lax
from jax.experimental import pallas as pl
from jax.experimental.pallas import tpu as pltpu


OUT_W = 128   # lane-dense decoded-tags row width (padded; wrapper slices)


# -----------------------------------------------------------------------------
# Fused kernel: embedding gather + BiLSTM + fc + CRF Viterbi decode (1 sentence
# per grid step; batch is the grid axis).
# -----------------------------------------------------------------------------
def bilstm_crf_kernel(sent_ref,       # SMEM (B*T,) int32 token ids (scalar prefetch)
                      emb_ref,        # (V, E)   embedding table
                      wih_ref,        # (2E, 8H) packed input->gate weights
                      whh_ref,        # (2H, 8H) block-diagonal hidden->gate
                      b_ref,          # (1, 8H)  packed gate bias (b_ih + b_hh)
                      wfc_ref,        # (2H, N)  fc weight (transposed)
                      bfc_ref,        # (1, N)   fc bias
                      start_ref,      # (1, N)   CRF start transitions
                      end_ref,        # (1, N)   CRF end transitions
                      trans_ref,      # (N, N)   CRF transitions [prev, cur]
                      tags_ref,       # out (1, 1, OUT_W) int32 decoded tags
                      *, T, H, lo, hi):
    E = emb_ref.shape[1]
    N = trans_ref.shape[0]
    Tp = hi - lo
    H2 = 2 * H
    out_w = tags_ref.shape[-1]
    b = pl.program_id(0)

    # ---- in-kernel embedding gather (items 1 & 2) ----------------------------
    # Gather the T rows once; the reversed-order copy reuses the same vregs.
    rows_f = [emb_ref[pl.ds(sent_ref[b * T + t], 1), :] for t in range(T)]   # T x (1,E)
    x_f = jnp.concatenate(rows_f, axis=0)                                    # (T, E)
    x_b = jnp.concatenate(rows_f[::-1], axis=0)                              # (T, E) = x[T-1-t]
    xcat = jnp.concatenate([x_f, x_b], axis=1)                               # (T, 2E)

    # Single MXU pass for both directions' input projections.
    xw = (jnp.dot(xcat, wih_ref[...], preferred_element_type=jnp.float32)
          + b_ref[...])                                                      # (T, 8H)

    whh = whh_ref[...]                                                       # (2H, 8H)

    # ---- fused fwd+bwd recurrence, fully unrolled, h rows kept in vregs ------
    # gate column layout: [i_f,i_b | f_f,f_b | o_f,o_b | g_f,g_b]
    h = jnp.zeros((1, H2), jnp.float32)      # [h_fwd | h_bwd] (zeros: init_hidden)
    c = jnp.zeros((1, H2), jnp.float32)
    h_rows = []
    for s in range(T):
        gates = xw[s:s + 1, :] + jnp.dot(h, whh, preferred_element_type=jnp.float32)
        sig = jax.nn.sigmoid(gates[:, 0:3 * H2])               # i | f | o (both dirs)
        g = jnp.tanh(gates[:, 3 * H2:4 * H2])                  # g         (both dirs)
        c = sig[:, H2:2 * H2] * c + sig[:, 0:H2] * g
        h = sig[:, 2 * H2:3 * H2] * jnp.tanh(c)
        h_rows.append(h)                                       # stays in vregs

    # ---- merge directions per time step (pure VPU select) & project (item 3) -
    # time t output = [ h_fwd(step t) | h_bwd(step T-1-t) ]  -> no rev matmul.
    lane_h2 = lax.broadcasted_iota(jnp.int32, (1, H2), 1)
    merged = [jnp.where(lane_h2 < H, h_rows[t], h_rows[T - 1 - t]) for t in range(T)]
    hh = jnp.concatenate(merged, axis=0)                                     # (T, 2H)
    feats = (jnp.dot(hh, wfc_ref[...], preferred_element_type=jnp.float32)
             + bfc_ref[...])                                                 # (T, N)
    em = feats[lo:hi, :]                                   # static phrase slice (Tp, N)

    # ---- CRF Viterbi forward: one packed (value,index) reduce per step (item 4)
    idx_bits = max((N - 1).bit_length(), 1)
    mask = (1 << idx_bits) - 1
    not_mask = ~mask

    def to_key(f):          # f32 -> int32, order preserving (sortable key)
        s = pltpu.bitcast(f, jnp.int32)
        mag = s & 0x7FFFFFFF
        return jnp.where(s < 0, -mag, mag)

    def from_key(k):        # int32 key -> f32
        mag = jnp.where(k < 0, -k, k)
        bits = jnp.where(k < 0, mag | jnp.int32(-2147483648), mag)
        return pltpu.bitcast(bits, jnp.float32)

    trans = trans_ref[...]
    row_iota = lax.broadcasted_iota(jnp.int32, (N, N), 0)
    col_iota = lax.broadcasted_iota(jnp.int32, (N, N), 1)
    eye = (row_iota == col_iota).astype(jnp.float32)
    lane_n = lax.broadcasted_iota(jnp.int32, (1, N), 1)
    inv_row = (N - 1) - row_iota        # smaller prev-tag -> larger payload (first-max)

    score = start_ref[...] + em[0:1, :]                                      # (1, N)
    history = []
    for t in range(1, Tp):
        score_col = jnp.sum(eye * score, axis=1, keepdims=True)              # (N, 1)
        packed = (to_key(score_col + trans) & not_mask) | inv_row            # (N, N)
        best = jnp.max(packed, axis=0, keepdims=True)         # single reduce: max+argmax
        history.append((N - 1) - (best & mask))                              # (1, N) bp
        score = from_key(best & not_mask) + em[t:t + 1, :]
    score = score + end_ref[...]

    packed = (to_key(score) & not_mask) | ((N - 1) - lane_n)
    best = jnp.max(packed, axis=1, keepdims=True)                            # (1, 1)
    cur = (N - 1) - (best & mask)                                # best last tag (1, 1)

    # ---- backtrack (unrolled), single lane-dense row store (item 8) ----------
    out_iota = lax.broadcasted_iota(jnp.int32, (1, out_w), 1)
    tags_row = jnp.where(out_iota == Tp - 1, cur, 0)
    for t in range(Tp - 1, 0, -1):
        bp = history[t - 1]                                                  # (1, N)
        cur = jnp.sum(jnp.where(lane_n == cur, bp, 0), axis=1, keepdims=True)
        tags_row = jnp.where(out_iota == t - 1, cur, tags_row)
    tags_ref[...] = tags_row.reshape(1, 1, out_w)


# -----------------------------------------------------------------------------
# Host-side weight packing (done once): build the fused-gate layout.
# -----------------------------------------------------------------------------
def _split_gates(w):
    # PyTorch LSTM gate order along the 4H axis: i, f, g, o
    return jnp.split(w, 4, axis=-1)


def pack_bilstm_params(p):
    """Pack per-direction weights into the kernel's fused layout.

    Gate columns: [i_f, i_b, f_f, f_b, o_f, o_b, g_f, g_b] (each width H).
    wih_comb rows 0:E multiply x_t, rows E:2E multiply x_{T-1-t}.
    whh_comb is block-diagonal: rows 0:H (h_fwd) feed fwd gate columns,
    rows H:2H (h_bwd) feed bwd gate columns.
    """
    H = p["whh_f"].shape[0]

    def pack_cols(f_parts, b_parts):
        i_f, f_f, g_f, o_f = f_parts
        i_b, f_b, g_b, o_b = b_parts
        return jnp.concatenate([i_f, i_b, f_f, f_b, o_f, o_b, g_f, g_b], axis=-1)

    zE = jnp.zeros_like(p["wih_f"][:, :H])
    zH = jnp.zeros_like(p["whh_f"][:, :H])

    wih_comb = jnp.concatenate([
        pack_cols(_split_gates(p["wih_f"]), (zE, zE, zE, zE)),
        pack_cols((zE, zE, zE, zE), _split_gates(p["wih_b"])),
    ], axis=0)                                                         # (2E, 8H)
    whh_comb = jnp.concatenate([
        pack_cols(_split_gates(p["whh_f"]), (zH, zH, zH, zH)),
        pack_cols((zH, zH, zH, zH), _split_gates(p["whh_b"])),
    ], axis=0)                                                         # (2H, 8H)
    b_comb = pack_cols(_split_gates(p["b_f"]), _split_gates(p["b_b"]))  # (1, 8H)
    return wih_comb, whh_comb, b_comb


# -----------------------------------------------------------------------------
# Forward pass: one batched pallas_call (embedding gather happens in-kernel).
# -----------------------------------------------------------------------------
def bilstm_crf_forward(params, sentences, phrase_bounds):
    lo, hi = phrase_bounds                          # static python ints (feats[b:e])
    sentences = jnp.asarray(sentences, jnp.int32)
    if sentences.ndim == 1:
        sentences = sentences[None, :]
    B, T = sentences.shape
    H = params["whh_f"].shape[0]

    kernel = functools.partial(bilstm_crf_kernel, T=T, H=H, lo=lo, hi=hi)

    def full_spec(shape):
        nd = len(shape)
        return pl.BlockSpec(shape, lambda b, sent, _n=nd: (0,) * _n)

    grid_spec = pltpu.PrefetchScalarGridSpec(
        num_scalar_prefetch=1,                       # sentence ids -> SMEM
        grid=(B,),
        in_specs=[
            full_spec(params["embedding"].shape),
            full_spec(params["wih_comb"].shape),
            full_spec(params["whh_comb"].shape),
            full_spec(params["b_comb"].shape),
            full_spec(params["wfc"].shape),
            full_spec(params["bfc"].shape),
            full_spec(params["start"].shape),
            full_spec(params["end"].shape),
            full_spec(params["trans"].shape),
        ],
        out_specs=pl.BlockSpec((1, 1, OUT_W), lambda b, sent: (b, 0, 0)),
    )
    out = pl.pallas_call(
        kernel,
        out_shape=jax.ShapeDtypeStruct((B, 1, OUT_W), jnp.int32),
        grid_spec=grid_spec,
        compiler_params=pltpu.CompilerParams(
            dimension_semantics=("parallel",)),      # megacore-shard batch on v7x
    )(sentences.reshape(-1),
      params["embedding"].astype(jnp.float32),
      params["wih_comb"], params["whh_comb"], params["b_comb"],
      params["wfc"], params["bfc"],
      params["start"], params["end"], params["trans"])
    return out[:, 0, :hi - lo]                       # (B, Tp) decoded tags


# -----------------------------------------------------------------------------
# Deterministic parameter init (shapes from the module's __init__).
# -----------------------------------------------------------------------------
def init_params(key, embedding_dim, hidden_dim, vocab_size, tagset_size):
    H = hidden_dim // 2
    E = embedding_dim
    ks = jax.random.split(key, 14)
    sH = 1.0 / (H ** 0.5)
    sF = 1.0 / (hidden_dim ** 0.5)

    def u(k, shape, s):
        return jax.random.uniform(k, shape, jnp.float32, -s, s)

    p = dict(
        embedding=jax.random.normal(ks[0], (vocab_size, E), jnp.float32),
        # LSTM weights stored transposed ([in, 4H]); PyTorch gate order i,f,g,o.
        wih_f=u(ks[1], (E, 4 * H), sH),
        whh_f=u(ks[2], (H, 4 * H), sH),
        b_f=u(ks[3], (1, 4 * H), sH) + u(ks[4], (1, 4 * H), sH),   # b_ih + b_hh
        wih_b=u(ks[5], (E, 4 * H), sH),
        whh_b=u(ks[6], (H, 4 * H), sH),
        b_b=u(ks[7], (1, 4 * H), sH) + u(ks[8], (1, 4 * H), sH),
        # fc: hidden_dim -> tagset_size (stored transposed)
        wfc=u(ks[9], (hidden_dim, tagset_size), sF),
        bfc=u(ks[10], (1, tagset_size), sF),
        # CRF params (torchcrf init: uniform(-0.1, 0.1))
        start=u(ks[11], (1, tagset_size), 0.1),
        end=u(ks[12], (1, tagset_size), 0.1),
        trans=u(ks[13], (tagset_size, tagset_size), 0.1),
    )
    wih_comb, whh_comb, b_comb = pack_bilstm_params(p)
    p.update(wih_comb=wih_comb, whh_comb=whh_comb, b_comb=b_comb)
    return p


# -----------------------------------------------------------------------------
# Pure-JAX reference (mirrors the PyTorch module) for validation.
# -----------------------------------------------------------------------------
def reference_feats(params, sentence):
    x = params["embedding"][sentence].astype(jnp.float32)
    H = params["whh_f"].shape[0]

    def run_dir(xs, wih, whh, b):
        def step(carry, x_t):
            h, c = carry
            gates = x_t @ wih + h @ whh + b[0]
            i = jax.nn.sigmoid(gates[0:H])
            f = jax.nn.sigmoid(gates[H:2 * H])
            g = jnp.tanh(gates[2 * H:3 * H])
            o = jax.nn.sigmoid(gates[3 * H:4 * H])
            c = f * c + i * g
            h = o * jnp.tanh(c)
            return (h, c), h
        _, hs = lax.scan(step, (jnp.zeros(H), jnp.zeros(H)), xs)
        return hs

    fwd = run_dir(x, params["wih_f"], params["whh_f"], params["b_f"])
    bwd = run_dir(x[::-1], params["wih_b"], params["whh_b"], params["b_b"])[::-1]
    return jnp.concatenate([fwd, bwd], axis=1) @ params["wfc"] + params["bfc"][0]


def reference_decode(em, params):
    score = params["start"][0] + em[0]
    history = []
    for t in range(1, em.shape[0]):
        M = score[:, None] + params["trans"]        # (prev, cur)
        history.append(jnp.argmax(M, axis=0))
        score = jnp.max(M, axis=0) + em[t]
    score = score + params["end"][0]
    best = jnp.argmax(score)
    tags = [best]
    for bp in reversed(history):
        best = bp[tags[-1]]
        tags.append(best)
    return jnp.array(tags[::-1], dtype=jnp.int32)


def crf_path_score(em, tags, params):
    s = params["start"][0][tags[0]] + em[0, tags[0]]
    for t in range(1, em.shape[0]):
        s = s + params["trans"][tags[t - 1], tags[t]] + em[t, tags[t]]
    return s + params["end"][0][tags[-1]]


if __name__ == "__main__":
    embedding_dim = 16
    hidden_dim = 32          # -> H = 16 per direction
    vocab_size = 50
    tagset_size = 5
    T = 8
    B = 4
    phrase_bounds = (1, 7)   # static ints, Tp = 6

    key = jax.random.PRNGKey(0)
    kp, ksent = jax.random.split(key)
    params = init_params(kp, embedding_dim, hidden_dim, vocab_size, tagset_size)
    sentences = jax.random.randint(ksent, (B, T), 0, vocab_size, dtype=jnp.int32)

    tags = bilstm_crf_forward(params, sentences, phrase_bounds)
    tags = jax.block_until_ready(tags)

    lo, hi = phrase_bounds
    assert tags.shape == (B, hi - lo)
    assert tags.dtype == jnp.int32

    # validate against a pure-JAX reference of the PyTorch forward, per sentence
    for bi in range(B):
        em_ref = reference_feats(params, sentences[bi])[lo:hi]
        ref_tags = reference_decode(em_ref, params)
        if not bool(jnp.array_equal(tags[bi], ref_tags)):
            # tolerate fp-noise near-ties: kernel path must still be (near-)optimal
            s_kernel = crf_path_score(em_ref, tags[bi], params)
            s_ref = crf_path_score(em_ref, ref_tags, params)
            assert float(s_kernel) >= float(s_ref) - 1e-3, (bi, tags[bi], ref_tags)

    print("KERNEL_OK")
</pallas_src>

<mosaic_0001>
module attributes {stable_mosaic.version = 11 : i64} {
  func.func @bilstm_crf_kernel(%arg0: i32, %arg1: memref<32xi32, #tpu.memory_space<smem>>, %arg2: memref<50x16xf32, #tpu.memory_space<vmem>>, %arg3: memref<32x128xf32, #tpu.memory_space<vmem>>, %arg4: memref<32x128xf32, #tpu.memory_space<vmem>>, %arg5: memref<1x128xf32, #tpu.memory_space<vmem>>, %arg6: memref<32x5xf32, #tpu.memory_space<vmem>>, %arg7: memref<1x5xf32, #tpu.memory_space<vmem>>, %arg8: memref<1x5xf32, #tpu.memory_space<vmem>>, %arg9: memref<1x5xf32, #tpu.memory_space<vmem>>, %arg10: memref<5x5xf32, #tpu.memory_space<vmem>>, %arg11: memref<1x1x128xi32, #tpu.memory_space<vmem>>) attributes {dimension_semantics = [#tpu.dimension_semantics<parallel>], iteration_bounds = array<i64: 4>, scalar_prefetch = 1 : i64, scratch_operands = 0 : i64, tpu.core_type = #tpu.core_type<tc>, window_params = [{pipeline_mode = #tpu.pipeline_mode<synchronous>, transform_indices = @transform_0, window_bounds = array<i64: 50, 16>}, {pipeline_mode = #tpu.pipeline_mode<synchronous>, transform_indices = @transform_1, window_bounds = array<i64: 32, 128>}, {pipeline_mode = #tpu.pipeline_mode<synchronous>, transform_indices = @transform_2, window_bounds = array<i64: 32, 128>}, {pipeline_mode = #tpu.pipeline_mode<synchronous>, transform_indices = @transform_3, window_bounds = array<i64: 1, 128>}, {pipeline_mode = #tpu.pipeline_mode<synchronous>, transform_indices = @transform_4, window_bounds = array<i64: 32, 5>}, {pipeline_mode = #tpu.pipeline_mode<synchronous>, transform_indices = @transform_5, window_bounds = array<i64: 1, 5>}, {pipeline_mode = #tpu.pipeline_mode<synchronous>, transform_indices = @transform_6, window_bounds = array<i64: 1, 5>}, {pipeline_mode = #tpu.pipeline_mode<synchronous>, transform_indices = @transform_7, window_bounds = array<i64: 1, 5>}, {pipeline_mode = #tpu.pipeline_mode<synchronous>, transform_indices = @transform_8, window_bounds = array<i64: 5, 5>}, {transform_indices = @transform_9, window_bounds = array<i64: 1, 1, 128>}]} {
    %c8_i32 = arith.constant 8 : i32
    %0 = arith.muli %arg0, %c8_i32 : i32
    %c0_i32 = arith.constant 0 : i32
    %1 = arith.addi %0, %c0_i32 : i32
    %2 = arith.index_cast %1 : i32 to index
    %3 = memref.load %arg1[%2] : memref<32xi32, #tpu.memory_space<smem>>
    %4 = arith.index_cast %3 : i32 to index
    %c0 = arith.constant 0 : index
    %5 = vector.load %arg2[%4, %c0] : memref<50x16xf32, #tpu.memory_space<vmem>>, vector<1x16xf32>
    %c8_i32_0 = arith.constant 8 : i32
    %6 = arith.muli %arg0, %c8_i32_0 : i32
    %c1_i32 = arith.constant 1 : i32
    %7 = arith.addi %6, %c1_i32 : i32
    %8 = arith.index_cast %7 : i32 to index
    %9 = memref.load %arg1[%8] : memref<32xi32, #tpu.memory_space<smem>>
    %10 = arith.index_cast %9 : i32 to index
    %c0_1 = arith.constant 0 : index
    %11 = vector.load %arg2[%10, %c0_1] : memref<50x16xf32, #tpu.memory_space<vmem>>, vector<1x16xf32>
    %c8_i32_2 = arith.constant 8 : i32
    %12 = arith.muli %arg0, %c8_i32_2 : i32
    %c2_i32 = arith.constant 2 : i32
    %13 = arith.addi %12, %c2_i32 : i32
    %14 = arith.index_cast %13 : i32 to index
    %15 = memref.load %arg1[%14] : memref<32xi32, #tpu.memory_space<smem>>
    %16 = arith.index_cast %15 : i32 to index
    %c0_3 = arith.constant 0 : index
    %17 = vector.load %arg2[%16, %c0_3] : memref<50x16xf32, #tpu.memory_space<vmem>>, vector<1x16xf32>
    %c8_i32_4 = arith.constant 8 : i32
    %18 = arith.muli %arg0, %c8_i32_4 : i32
    %c3_i32 = arith.constant 3 : i32
    %19 = arith.addi %18, %c3_i32 : i32
    %20 = arith.index_cast %19 : i32 to index
    %21 = memref.load %arg1[%20] : memref<32xi32, #tpu.memory_space<smem>>
    %22 = arith.index_cast %21 : i32 to index
    %c0_5 = arith.constant 0 : index
    %23 = vector.load %arg2[%22, %c0_5] : memref<50x16xf32, #tpu.memory_space<vmem>>, vector<1x16xf32>
    %c8_i32_6 = arith.constant 8 : i32
    %24 = arith.muli %arg0, %c8_i32_6 : i32
    %c4_i32 = arith.constant 4 : i32
    %25 = arith.addi %24, %c4_i32 : i32
    %26 = arith.index_cast %25 : i32 to index
    %27 = memref.load %arg1[%26] : memref<32xi32, #tpu.memory_space<smem>>
    %28 = arith.index_cast %27 : i32 to index
    %c0_7 = arith.constant 0 : index
    %29 = vector.load %arg2[%28, %c0_7] : memref<50x16xf32, #tpu.memory_space<vmem>>, vector<1x16xf32>
    %c8_i32_8 = arith.constant 8 : i32
    %30 = arith.muli %arg0, %c8_i32_8 : i32
    %c5_i32 = arith.constant 5 : i32
    %31 = arith.addi %30, %c5_i32 : i32
    %32 = arith.index_cast %31 : i32 to index
    %33 = memref.load %arg1[%32] : memref<32xi32, #tpu.memory_space<smem>>
    %34 = arith.index_cast %33 : i32 to index
    %c0_9 = arith.constant 0 : index
    %35 = vector.load %arg2[%34, %c0_9] : memref<50x16xf32, #tpu.memory_space<vmem>>, vector<1x16xf32>
    %c8_i32_10 = arith.constant 8 : i32
    %36 = arith.muli %arg0, %c8_i32_10 : i32
    %c6_i32 = arith.constant 6 : i32
    %37 = arith.addi %36, %c6_i32 : i32
    %38 = arith.index_cast %37 : i32 to index
    %39 = memref.load %arg1[%38] : memref<32xi32, #tpu.memory_space<smem>>
    %40 = arith.index_cast %39 : i32 to index
    %c0_11 = arith.constant 0 : index
    %41 = vector.load %arg2[%40, %c0_11] : memref<50x16xf32, #tpu.memory_space<vmem>>, vector<1x16xf32>
    %c8_i32_12 = arith.constant 8 : i32
    %42 = arith.muli %arg0, %c8_i32_12 : i32
    %c7_i32 = arith.constant 7 : i32
    %43 = arith.addi %42, %c7_i32 : i32
    %44 = arith.index_cast %43 : i32 to index
    %45 = memref.load %arg1[%44] : memref<32xi32, #tpu.memory_space<smem>>
    %46 = arith.index_cast %45 : i32 to index
    %c0_13 = arith.constant 0 : index
    %47 = vector.load %arg2[%46, %c0_13] : memref<50x16xf32, #tpu.memory_space<vmem>>, vector<1x16xf32>
    %48 = tpu.concatenate %5, %11, %17, %23, %29, %35, %41, %47 in 0 : vector<1x16xf32>, vector<1x16xf32>, vector<1x16xf32>, vector<1x16xf32>, vector<1x16xf32>, vector<1x16xf32>, vector<1x16xf32>, vector<1x16xf32> -> vector<8x16xf32>
    %49 = tpu.concatenate %47, %41, %35, %29, %23, %17, %11, %5 in 0 : vector<1x16xf32>, vector<1x16xf32>, vector<1x16xf32>, vector<1x16xf32>, vector<1x16xf32>, vector<1x16xf32>, vector<1x16xf32>, vector<1x16xf32> -> vector<8x16xf32>
    %50 = tpu.concatenate %48, %49 in 1 : vector<8x16xf32>, vector<8x16xf32> -> vector<8x32xf32>
    %c0_14 = arith.constant 0 : index
    %c0_15 = arith.constant 0 : index
    %51 = vector.load %arg3[%c0_14, %c0_15] : memref<32x128xf32, #tpu.memory_space<vmem>>, vector<32x128xf32>
    %cst = arith.constant dense<0.000000e+00> : vector<8x128xf32>
    %52 = tpu.matmul %50, %51, %cst {dimension_numbers = #tpu.dot_dimension_numbers<[1], [0], [0], [1], [0, 0, 1, 1], [], []>} : vector<8x32xf32>, vector<32x128xf32>, vector<8x128xf32> -> vector<8x128xf32>
    %c0_16 = arith.constant 0 : index
    %c0_17 = arith.constant 0 : index
    %53 = vector.load %arg5[%c0_16, %c0_17] : memref<1x128xf32, #tpu.memory_space<vmem>>, vector<1x128xf32>
    %54 = vector.broadcast %53 : vector<1x128xf32> to vector<8x128xf32>
    %55 = arith.addf %52, %54 : vector<8x128xf32>
    %c0_18 = arith.constant 0 : index
    %c0_19 = arith.constant 0 : index
    %56 = vector.load %arg4[%c0_18, %c0_19] : memref<32x128xf32, #tpu.memory_space<vmem>>, vector<32x128xf32>
    %cst_20 = arith.constant 0.000000e+00 : f32
    %57 = vector.broadcast %cst_20 : f32 to vector<1x32xf32>
    %cst_21 = arith.constant 0.000000e+00 : f32
    %58 = vector.broadcast %cst_21 : f32 to vector<1x32xf32>
    %59 = vector.extract_strided_slice %55 {offsets = [0, 0], sizes = [1, 128], strides = [1, 1]} : vector<8x128xf32> to vector<1x128xf32>
    %cst_22 = arith.constant dense<0.000000e+00> : vector<1x128xf32>
    %60 = tpu.matmul %57, %56, %cst_22 {dimension_numbers = #tpu.dot_dimension_numbers<[1], [0], [0], [1], [0, 0, 1, 1], [], []>} : vector<1x32xf32>, vector<32x128xf32>, vector<1x128xf32> -> vector<1x128xf32>
    %61 = arith.addf %59, %60 : vector<1x128xf32>
    %62 = vector.extract_strided_slice %61 {offsets = [0, 0], sizes = [1, 96], strides = [1, 1]} : vector<1x128xf32> to vector<1x96xf32>
    %63 = arith.negf %62 : vector<1x96xf32>
    %64 = math.exp %63 : vector<1x96xf32>
    %cst_23 = arith.constant 1.000000e+00 : f32
    %65 = vector.broadcast %cst_23 : f32 to vector<1x96xf32>
    %66 = arith.addf %65, %64 : vector<1x96xf32>
    %67 = arith.divf %65, %66 : vector<1x96xf32>
    %68 = vector.extract_strided_slice %61 {offsets = [0, 96], sizes = [1, 32], strides = [1, 1]} : vector<1x128xf32> to vector<1x32xf32>
    %69 = math.tanh %68 : vector<1x32xf32>
    %70 = vector.extract_strided_slice %67 {offsets = [0, 32], sizes = [1, 32], strides = [1, 1]} : vector<1x96xf32> to vector<1x32xf32>
    %71 = arith.mulf %70, %58 : vector<1x32xf32>
    %72 = vector.extract_strided_slice %67 {offsets = [0, 0], sizes = [1, 32], strides = [1, 1]} : vector<1x96xf32> to vector<1x32xf32>
    %73 = arith.mulf %72, %69 : vector<1x32xf32>
    %74 = arith.addf %71, %73 : vector<1x32xf32>
    %75 = vector.extract_strided_slice %67 {offsets = [0, 64], sizes = [1, 32], strides = [1, 1]} : vector<1x96xf32> to vector<1x32xf32>
    %76 = math.tanh %74 : vector<1x32xf32>
    %77 = arith.mulf %75, %76 : vector<1x32xf32>
    %78 = vector.extract_strided_slice %55 {offsets = [1, 0], sizes = [1, 128], strides = [1, 1]} : vector<8x128xf32> to vector<1x128xf32>
    %cst_24 = arith.constant dense<0.000000e+00> : vector<1x128xf32>
    %79 = tpu.matmul %77, %56, %cst_24 {dimension_numbers = #tpu.dot_dimension_numbers<[1], [0], [0], [1], [0, 0, 1, 1], [], []>} : vector<1x32xf32>, vector<32x128xf32>, vector<1x128xf32> -> vector<1x128xf32>
    %80 = arith.addf %78, %79 : vector<1x128xf32>
    %81 = vector.extract_strided_slice %80 {offsets = [0, 0], sizes = [1, 96], strides = [1, 1]} : vector<1x128xf32> to vector<1x96xf32>
    %82 = arith.negf %81 : vector<1x96xf32>
    %83 = math.exp %82 : vector<1x96xf32>
    %cst_25 = arith.constant 1.000000e+00 : f32
    %84 = vector.broadcast %cst_25 : f32 to vector<1x96xf32>
    %85 = arith.addf %84, %83 : vector<1x96xf32>
    %86 = arith.divf %84, %85 : vector<1x96xf32>
    %87 = vector.extract_strided_slice %80 {offsets = [0, 96], sizes = [1, 32], strides = [1, 1]} : vector<1x128xf32> to vector<1x32xf32>
    %88 = math.tanh %87 : vector<1x32xf32>
    %89 = vector.extract_strided_slice %86 {offsets = [0, 32], sizes = [1, 32], strides = [1, 1]} : vector<1x96xf32> to vector<1x32xf32>
    %90 = arith.mulf %89, %74 : vector<1x32xf32>
    %91 = vector.extract_strided_slice %86 {offsets = [0, 0], sizes = [1, 32], strides = [1, 1]} : vector<1x96xf32> to vector<1x32xf32>
    %92 = arith.mulf %91, %88 : vector<1x32xf32>
    %93 = arith.addf %90, %92 : vector<1x32xf32>
    %94 = vector.extract_strided_slice %86 {offsets = [0, 64], sizes = [1, 32], strides = [1, 1]} : vector<1x96xf32> to vector<1x32xf32>
    %95 = math.tanh %93 : vector<1x32xf32>
    %96 = arith.mulf %94, %95 : vector<1x32xf32>
    %97 = vector.extract_strided_slice %55 {offsets = [2, 0], sizes = [1, 128], strides = [1, 1]} : vector<8x128xf32> to vector<1x128xf32>
    %cst_26 = arith.constant dense<0.000000e+00> : vector<1x128xf32>
    %98 = tpu.matmul %96, %56, %cst_26 {dimension_numbers = #tpu.dot_dimension_numbers<[1], [0], [0], [1], [0, 0, 1, 1], [], []>} : vector<1x32xf32>, vector<32x128xf32>, vector<1x128xf32> -> vector<1x128xf32>
    %99 = arith.addf %97, %98 : vector<1x128xf32>
    %100 = vector.extract_strided_slice %99 {offsets = [0, 0], sizes = [1, 96], strides = [1, 1]} : vector<1x128xf32> to vector<1x96xf32>
    %101 = arith.negf %100 : vector<1x96xf32>
    %102 = math.exp %101 : vector<1x96xf32>
    %cst_27 = arith.constant 1.000000e+00 : f32
    %103 = vector.broadcast %cst_27 : f32 to vector<1x96xf32>
    %104 = arith.addf %103, %102 : vector<1x96xf32>
    %105 = arith.divf %103, %104 : vector<1x96xf32>
    %106 = vector.extract_strided_slice %99 {offsets = [0, 96], sizes = [1, 32], strides = [1, 1]} : vector<1x128xf32> to vector<1x32xf32>
    %107 = math.tanh %106 : vector<1x32xf32>
    %108 = vector.extract_strided_slice %105 {offsets = [0, 32], sizes = [1, 32], strides = [1, 1]} : vector<1x96xf32> to vector<1x32xf32>
    %109 = arith.mulf %108, %93 : vector<1x32xf32>
    %110 = vector.extract_strided_slice %105 {offsets = [0, 0], sizes = [1, 32], strides = [1, 1]} : vector<1x96xf32> to vector<1x32xf32>
    %111 = arith.mulf %110, %107 : vector<1x32xf32>
    %112 = arith.addf %109, %111 : vector<1x32xf32>
    %113 = vector.extract_strided_slice %105 {offsets = [0, 64], sizes = [1, 32], strides = [1, 1]} : vector<1x96xf32> to vector<1x32xf32>
    %114 = math.tanh %112 : vector<1x32xf32>
    %115 = arith.mulf %113, %114 : vector<1x32xf32>
    %116 = vector.extract_strided_slice %55 {offsets = [3, 0], sizes = [1, 128], strides = [1, 1]} : vector<8x128xf32> to vector<1x128xf32>
    %cst_28 = arith.constant dense<0.000000e+00> : vector<1x128xf32>
    %117 = tpu.matmul %115, %56, %cst_28 {dimension_numbers = #tpu.dot_dimension_numbers<[1], [0], [0], [1], [0, 0, 1, 1], [], []>} : vector<1x32xf32>, vector<32x128xf32>, vector<1x128xf32> -> vector<1x128xf32>
    %118 = arith.addf %116, %117 : vector<1x128xf32>
    %119 = vector.extract_strided_slice %118 {offsets = [0, 0], sizes = [1, 96], strides = [1, 1]} : vector<1x128xf32> to vector<1x96xf32>
    %120 = arith.negf %119 : vector<1x96xf32>
    %121 = math.exp %120 : vector<1x96xf32>
    %cst_29 = arith.constant 1.000000e+00 : f32
    %122 = vector.broadcast %cst_29 : f32 to vector<1x96xf32>
    %123 = arith.addf %122, %121 : vector<1x96xf32>
    %124 = arith.divf %122, %123 : vector<1x96xf32>
    %125 = vector.extract_strided_slice %118 {offsets = [0, 96], sizes = [1, 32], strides = [1, 1]} : vector<1x128xf32> to vector<1x32xf32>
    %126 = math.tanh %125 : vector<1x32xf32>
    %127 = vector.extract_strided_slice %124 {offsets = [0, 32], sizes = [1, 32], strides = [1, 1]} : vector<1x96xf32> to vector<1x32xf32>
    %128 = arith.mulf %127, %112 : vector<1x32xf32>
    %129 = vector.extract_strided_slice %124 {offsets = [0, 0], sizes = [1, 32], strides = [1, 1]} : vector<1x96xf32> to vector<1x32xf32>
    %130 = arith.mulf %129, %126 : vector<1x32xf32>
    %131 = arith.addf %128, %130 : vector<1x32xf32>
    %132 = vector.extract_strided_slice %124 {offsets = [0, 64], sizes = [1, 32], strides = [1, 1]} : vector<1x96xf32> to vector<1x32xf32>
    %133 = math.tanh %131 : vector<1x32xf32>
    %134 = arith.mulf %132, %133 : vector<1x32xf32>
    %135 = vector.extract_strided_slice %55 {offsets = [4, 0], sizes = [1, 128], strides = [1, 1]} : vector<8x128xf32> to vector<1x128xf32>
    %cst_30 = arith.constant dense<0.000000e+00> : vector<1x128xf32>
    %136 = tpu.matmul %134, %56, %cst_30 {dimension_numbers = #tpu.dot_dimension_numbers<[1], [0], [0], [1], [0, 0, 1, 1], [], []>} : vector<1x32xf32>, vector<32x128xf32>, vector<1x128xf32> -> vector<1x128xf32>
    %137 = arith.addf %135, %136 : vector<1x128xf32>
    %138 = vector.extract_strided_slice %137 {offsets = [0, 0], sizes = [1, 96], strides = [1, 1]} : vector<1x128xf32> to vector<1x96xf32>
    %139 = arith.negf %138 : vector<1x96xf32>
    %140 = math.exp %139 : vector<1x96xf32>
    %cst_31 = arith.constant 1.000000e+00 : f32
    %141 = vector.broadcast %cst_31 : f32 to vector<1x96xf32>
    %142 = arith.addf %141, %140 : vector<1x96xf32>
    %143 = arith.divf %141, %142 : vector<1x96xf32>
    %144 = vector.extract_strided_slice %137 {offsets = [0, 96], sizes = [1, 32], strides = [1, 1]} : vector<1x128xf32> to vector<1x32xf32>
    %145 = math.tanh %144 : vector<1x32xf32>
    %146 = vector.extract_strided_slice %143 {offsets = [0, 32], sizes = [1, 32], strides = [1, 1]} : vector<1x96xf32> to vector<1x32xf32>
    %147 = arith.mulf %146, %131 : vector<1x32xf32>
    %148 = vector.extract_strided_slice %143 {offsets = [0, 0], sizes = [1, 32], strides = [1, 1]} : vector<1x96xf32> to vector<1x32xf32>
    %149 = arith.mulf %148, %145 : vector<1x32xf32>
    %150 = arith.addf %147, %149 : vector<1x32xf32>
    %151 = vector.extract_strided_slice %143 {offsets = [0, 64], sizes = [1, 32], strides = [1, 1]} : vector<1x96xf32> to vector<1x32xf32>
    %152 = math.tanh %150 : vector<1x32xf32>
    %153 = arith.mulf %151, %152 : vector<1x32xf32>
    %154 = vector.extract_strided_slice %55 {offsets = [5, 0], sizes = [1, 128], strides = [1, 1]} : vector<8x128xf32> to vector<1x128xf32>
    %cst_32 = arith.constant dense<0.000000e+00> : vector<1x128xf32>
    %155 = tpu.matmul %153, %56, %cst_32 {dimension_numbers = #tpu.dot_dimension_numbers<[1], [0], [0], [1], [0, 0, 1, 1], [], []>} : vector<1x32xf32>, vector<32x128xf32>, vector<1x128xf32> -> vector<1x128xf32>
    %156 = arith.addf %154, %155 : vector<1x128xf32>
    %157 = vector.extract_strided_slice %156 {offsets = [0, 0], sizes = [1, 96], strides = [1, 1]} : vector<1x128xf32> to vector<1x96xf32>
    %158 = arith.negf %157 : vector<1x96xf32>
    %159 = math.exp %158 : vector<1x96xf32>
    %cst_33 = arith.constant 1.000000e+00 : f32
    %160 = vector.broadcast %cst_33 : f32 to vector<1x96xf32>
    %161 = arith.addf %160, %159 : vector<1x96xf32>
    %162 = arith.divf %160, %161 : vector<1x96xf32>
    %163 = vector.extract_strided_slice %156 {offsets = [0, 96], sizes = [1, 32], strides = [1, 1]} : vector<1x128xf32> to vector<1x32xf32>
    %164 = math.tanh %163 : vector<1x32xf32>
    %165 = vector.extract_strided_slice %162 {offsets = [0, 32], sizes = [1, 32], strides = [1, 1]} : vector<1x96xf32> to vector<1x32xf32>
    %166 = arith.mulf %165, %150 : vector<1x32xf32>
    %167 = vector.extract_strided_slice %162 {offsets = [0, 0], sizes = [1, 32], strides = [1, 1]} : vector<1x96xf32> to vector<1x32xf32>
    %168 = arith.mulf %167, %164 : vector<1x32xf32>
    %169 = arith.addf %166, %168 : vector<1x32xf32>
    %170 = vector.extract_strided_slice %162 {offsets = [0, 64], sizes = [1, 32], strides = [1, 1]} : vector<1x96xf32> to vector<1x32xf32>
    %171 = math.tanh %169 : vector<1x32xf32>
    %172 = arith.mulf %170, %171 : vector<1x32xf32>
    %173 = vector.extract_strided_slice %55 {offsets = [6, 0], sizes = [1, 128], strides = [1, 1]} : vector<8x128xf32> to vector<1x128xf32>
    %cst_34 = arith.constant dense<0.000000e+00> : vector<1x128xf32>
    %174 = tpu.matmul %172, %56, %cst_34 {dimension_numbers = #tpu.dot_dimension_numbers<[1], [0], [0], [1], [0, 0, 1, 1], [], []>} : vector<1x32xf32>, vector<32x128xf32>, vector<1x128xf32> -> vector<1x128xf32>
    %175 = arith.addf %173, %174 : vector<1x128xf32>
    %176 = vector.extract_strided_slice %175 {offsets = [0, 0], sizes = [1, 96], strides = [1, 1]} : vector<1x128xf32> to vector<1x96xf32>
    %177 = arith.negf %176 : vector<1x96xf32>
    %178 = math.exp %177 : vector<1x96xf32>
    %cst_35 = arith.constant 1.000000e+00 : f32
    %179 = vector.broadcast %cst_35 : f32 to vector<1x96xf32>
    %180 = arith.addf %179, %178 : vector<1x96xf32>
    %181 = arith.divf %179, %180 : vector<1x96xf32>
    %182 = vector.extract_strided_slice %175 {offsets = [0, 96], sizes = [1, 32], strides = [1, 1]} : vector<1x128xf32> to vector<1x32xf32>
    %183 = math.tanh %182 : vector<1x32xf32>
    %184 = vector.extract_strided_slice %181 {offsets = [0, 32], sizes = [1, 32], strides = [1, 1]} : vector<1x96xf32> to vector<1x32xf32>
    %185 = arith.mulf %184, %169 : vector<1x32xf32>
    %186 = vector.extract_strided_slice %181 {offsets = [0, 0], sizes = [1, 32], strides = [1, 1]} : vector<1x96xf32> to vector<1x32xf32>
    %187 = arith.mulf %186, %183 : vector<1x32xf32>
    %188 = arith.addf %185, %187 : vector<1x32xf32>
    %189 = vector.extract_strided_slice %181 {offsets = [0, 64], sizes = [1, 32], strides = [1, 1]} : vector<1x96xf32> to vector<1x32xf32>
    %190 = math.tanh %188 : vector<1x32xf32>
    %191 = arith.mulf %189, %190 : vector<1x32xf32>
    %192 = vector.extract_strided_slice %55 {offsets = [7, 0], sizes = [1, 128], strides = [1, 1]} : vector<8x128xf32> to vector<1x128xf32>
    %cst_36 = arith.constant dense<0.000000e+00> : vector<1x128xf32>
    %193 = tpu.matmul %191, %56, %cst_36 {dimension_numbers = #tpu.dot_dimension_numbers<[1], [0], [0], [1], [0, 0, 1, 1], [], []>} : vector<1x32xf32>, vector<32x128xf32>, vector<1x128xf32> -> vector<1x128xf32>
    %194 = arith.addf %192, %193 : vector<1x128xf32>
    %195 = vector.extract_strided_slice %194 {offsets = [0, 0], sizes = [1, 96], strides = [1, 1]} : vector<1x128xf32> to vector<1x96xf32>
    %196 = arith.negf %195 : vector<1x96xf32>
    %197 = math.exp %196 : vector<1x96xf32>
    %cst_37 = arith.constant 1.000000e+00 : f32
    %198 = vector.broadcast %cst_37 : f32 to vector<1x96xf32>
    %199 = arith.addf %198, %197 : vector<1x96xf32>
    %200 = arith.divf %198, %199 : vector<1x96xf32>
    %201 = vector.extract_strided_slice %194 {offsets = [0, 96], sizes = [1, 32], strides = [1, 1]} : vector<1x128xf32> to vector<1x32xf32>
    %202 = math.tanh %201 : vector<1x32xf32>
    %203 = vector.extract_strided_slice %200 {offsets = [0, 32], sizes = [1, 32], strides = [1, 1]} : vector<1x96xf32> to vector<1x32xf32>
    %204 = arith.mulf %203, %188 : vector<1x32xf32>
    %205 = vector.extract_strided_slice %200 {offsets = [0, 0], sizes = [1, 32], strides = [1, 1]} : vector<1x96xf32> to vector<1x32xf32>
    %206 = arith.mulf %205, %202 : vector<1x32xf32>
    %207 = arith.addf %204, %206 : vector<1x32xf32>
    %208 = vector.extract_strided_slice %200 {offsets = [0, 64], sizes = [1, 32], strides = [1, 1]} : vector<1x96xf32> to vector<1x32xf32>
    %209 = math.tanh %207 : vector<1x32xf32>
    %210 = arith.mulf %208, %209 : vector<1x32xf32>
    %211 = tpu.iota {dimensions = array<i32: 1>} : vector<1x32xi32>
    %c16_i32 = arith.constant 16 : i32
    %212 = vector.broadcast %c16_i32 : i32 to vector<1x32xi32>
    %213 = arith.cmpi slt, %211, %212 : vector<1x32xi32>
    %214 = arith.select %213, %77, %210 : vector<1x32xi1>, vector<1x32xf32>
    %c16_i32_38 = arith.constant 16 : i32
    %215 = vector.broadcast %c16_i32_38 : i32 to vector<1x32xi32>
    %216 = arith.cmpi slt, %211, %215 : vector<1x32xi32>
    %217 = arith.select %216, %96, %191 : vector<1x32xi1>, vector<1x32xf32>
    %c16_i32_39 = arith.constant 16 : i32
    %218 = vector.broadcast %c16_i32_39 : i32 to vector<1x32xi32>
    %219 = arith.cmpi slt, %211, %218 : vector<1x32xi32>
    %220 = arith.select %219, %115, %172 : vector<1x32xi1>, vector<1x32xf32>
    %c16_i32_40 = arith.constant 16 : i32
    %221 = vector.broadcast %c16_i32_40 : i32 to vector<1x32xi32>
    %222 = arith.cmpi slt, %211, %221 : vector<1x32xi32>
    %223 = arith.select %222, %134, %153 : vector<1x32xi1>, vector<1x32xf32>
    %c16_i32_41 = arith.constant 16 : i32
    %224 = vector.broadcast %c16_i32_41 : i32 to vector<1x32xi32>
    %225 = arith.cmpi slt, %211, %224 : vector<1x32xi32>
    %226 = arith.select %225, %153, %134 : vector<1x32xi1>, vector<1x32xf32>
    %c16_i32_42 = arith.constant 16 : i32
    %227 = vector.broadcast %c16_i32_42 : i32 to vector<1x32xi32>
    %228 = arith.cmpi slt, %211, %227 : vector<1x32xi32>
    %229 = arith.select %228, %172, %115 : vector<1x32xi1>, vector<1x32xf32>
    %c16_i32_43 = arith.constant 16 : i32
    %230 = vector.broadcast %c16_i32_43 : i32 to vector<1x32xi32>
    %231 = arith.cmpi slt, %211, %230 : vector<1x32xi32>
    %232 = arith.select %231, %191, %96 : vector<1x32xi1>, vector<1x32xf32>
    %c16_i32_44 = arith.constant 16 : i32
    %233 = vector.broadcast %c16_i32_44 : i32 to vector<1x32xi32>
    %234 = arith.cmpi slt, %211, %233 : vector<1x32xi32>
    %235 = arith.select %234, %210, %77 : vector<1x32xi1>, vector<1x32xf32>
    %236 = tpu.concatenate %214, %217, %220, %223, %226, %229, %232, %235 in 0 : vector<1x32xf32>, vector<1x32xf32>, vector<1x32xf32>, vector<1x32xf32>, vector<1x32xf32>, vector<1x32xf32>, vector<1x32xf32>, vector<1x32xf32> -> vector<8x32xf32>
    %c0_45 = arith.constant 0 : index
    %c0_46 = arith.constant 0 : index
    %237 = vector.load %arg6[%c0_45, %c0_46] : memref<32x5xf32, #tpu.memory_space<vmem>>, vector<32x5xf32>
    %cst_47 = arith.constant dense<0.000000e+00> : vector<8x5xf32>
    %238 = tpu.matmul %236, %237, %cst_47 {dimension_numbers = #tpu.dot_dimension_numbers<[1], [0], [0], [1], [0, 0, 1, 1], [], []>} : vector<8x32xf32>, vector<32x5xf32>, vector<8x5xf32> -> vector<8x5xf32>
    %c0_48 = arith.constant 0 : index
    %c0_49 = arith.constant 0 : index
    %239 = vector.load %arg7[%c0_48, %c0_49] : memref<1x5xf32, #tpu.memory_space<vmem>>, vector<1x5xf32>
    %240 = vector.broadcast %239 : vector<1x5xf32> to vector<8x5xf32>
    %241 = arith.addf %238, %240 : vector<8x5xf32>
    %242 = vector.extract_strided_slice %241 {offsets = [1, 0], sizes = [6, 5], strides = [1, 1]} : vector<8x5xf32> to vector<6x5xf32>
    %c0_50 = arith.constant 0 : index
    %c0_51 = arith.constant 0 : index
    %243 = vector.load %arg10[%c0_50, %c0_51] : memref<5x5xf32, #tpu.memory_space<vmem>>, vector<5x5xf32>
    %244 = tpu.iota {dimensions = array<i32: 0>} : vector<5x5xi32>
    %245 = tpu.iota {dimensions = array<i32: 1>} : vector<5x5xi32>
    %246 = arith.cmpi eq, %244, %245 : vector<5x5xi32>
    %247 = arith.extui %246 : vector<5x5xi1> to vector<5x5xi32>
    %248 = arith.sitofp %247 : vector<5x5xi32> to vector<5x5xf32>
    %249 = tpu.iota {dimensions = array<i32: 1>} : vector<1x5xi32>
    %c4_i32_52 = arith.constant 4 : i32
    %250 = vector.broadcast %c4_i32_52 : i32 to vector<5x5xi32>
    %251 = arith.subi %250, %244 : vector<5x5xi32>
    %c0_53 = arith.constant 0 : index
    %c0_54 = arith.constant 0 : index
    %252 = vector.load %arg8[%c0_53, %c0_54] : memref<1x5xf32, #tpu.memory_space<vmem>>, vector<1x5xf32>
    %253 = vector.extract_strided_slice %242 {offsets = [0, 0], sizes = [1, 5], strides = [1, 1]} : vector<6x5xf32> to vector<1x5xf32>
    %254 = arith.addf %252, %253 : vector<1x5xf32>
    %255 = vector.broadcast %254 : vector<1x5xf32> to vector<5x5xf32>
    %256 = arith.mulf %248, %255 : vector<5x5xf32>
    %cst_55 = arith.constant dense<0.000000e+00> : vector<5xf32>
    %257 = vector.multi_reduction <add>, %256, %cst_55 [1] : vector<5x5xf32> to vector<5xf32>
    %258 = vector.shape_cast %257 : vector<5xf32> to vector<5x1xf32>
    %259 = vector.broadcast %258 : vector<5x1xf32> to vector<5x5xf32>
    %260 = arith.addf %259, %243 : vector<5x5xf32>
    %261 = tpu.bitcast %260 : vector<5x5xf32> -> vector<5x5xi32>
    %c2147483647_i32 = arith.constant 2147483647 : i32
    %262 = vector.broadcast %c2147483647_i32 : i32 to vector<5x5xi32>
    %263 = arith.andi %261, %262 : vector<5x5xi32>
    %c0_i32_56 = arith.constant 0 : i32
    %264 = vector.broadcast %c0_i32_56 : i32 to vector<5x5xi32>
    %265 = arith.cmpi slt, %261, %264 : vector<5x5xi32>
    %c0_i32_57 = arith.constant 0 : i32
    %266 = vector.broadcast %c0_i32_57 : i32 to vector<5x5xi32>
    %267 = arith.subi %266, %263 : vector<5x5xi32>
    %268 = arith.select %265, %267, %263 : vector<5x5xi1>, vector<5x5xi32>
    %c-8_i32 = arith.constant -8 : i32
    %269 = vector.broadcast %c-8_i32 : i32 to vector<5x5xi32>
    %270 = arith.andi %268, %269 : vector<5x5xi32>
    %271 = arith.ori %270, %251 : vector<5x5xi32>
    %cst_58 = arith.constant dense<-2147483648> : vector<5xi32>
    %272 = vector.multi_reduction <maxsi>, %271, %cst_58 [0] : vector<5x5xi32> to vector<5xi32>
    %273 = vector.shape_cast %272 : vector<5xi32> to vector<1x5xi32>
    %c7_i32_59 = arith.constant 7 : i32
    %274 = vector.broadcast %c7_i32_59 : i32 to vector<1x5xi32>
    %275 = arith.andi %273, %274 : vector<1x5xi32>
    %c4_i32_60 = arith.constant 4 : i32
    %276 = vector.broadcast %c4_i32_60 : i32 to vector<1x5xi32>
    %277 = arith.subi %276, %275 : vector<1x5xi32>
    %c-8_i32_61 = arith.constant -8 : i32
    %278 = vector.broadcast %c-8_i32_61 : i32 to vector<1x5xi32>
    %279 = arith.andi %273, %278 : vector<1x5xi32>
    %c0_i32_62 = arith.constant 0 : i32
    %280 = vector.broadcast %c0_i32_62 : i32 to vector<1x5xi32>
    %281 = arith.cmpi slt, %279, %280 : vector<1x5xi32>
    %c0_i32_63 = arith.constant 0 : i32
    %282 = vector.broadcast %c0_i32_63 : i32 to vector<1x5xi32>
    %283 = arith.subi %282, %279 : vector<1x5xi32>
    %284 = arith.select %281, %283, %279 : vector<1x5xi1>, vector<1x5xi32>
    %c0_i32_64 = arith.constant 0 : i32
    %285 = vector.broadcast %c0_i32_64 : i32 to vector<1x5xi32>
    %286 = arith.cmpi slt, %279, %285 : vector<1x5xi32>
    %c-2147483648_i32 = arith.constant -2147483648 : i32
    %287 = vector.broadcast %c-2147483648_i32 : i32 to vector<1x5xi32>
    %288 = arith.ori %284, %287 : vector<1x5xi32>
    %289 = arith.select %286, %288, %284 : vector<1x5xi1>, vector<1x5xi32>
    %290 = tpu.bitcast %289 : vector<1x5xi32> -> vector<1x5xf32>
    %291 = vector.extract_strided_slice %242 {offsets = [1, 0], sizes = [1, 5], strides = [1, 1]} : vector<6x5xf32> to vector<1x5xf32>
    %292 = arith.addf %290, %291 : vector<1x5xf32>
    %293 = vector.broadcast %292 : vector<1x5xf32> to vector<5x5xf32>
    %294 = arith.mulf %248, %293 : vector<5x5xf32>
    %cst_65 = arith.constant dense<0.000000e+00> : vector<5xf32>
    %295 = vector.multi_reduction <add>, %294, %cst_65 [1] : vector<5x5xf32> to vector<5xf32>
    %296 = vector.shape_cast %295 : vector<5xf32> to vector<5x1xf32>
    %297 = vector.broadcast %296 : vector<5x1xf32> to vector<5x5xf32>
    %298 = arith.addf %297, %243 : vector<5x5xf32>
    %299 = tpu.bitcast %298 : vector<5x5xf32> -> vector<5x5xi32>
    %c2147483647_i32_66 = arith.constant 2147483647 : i32
    %300 = vector.broadcast %c2147483647_i32_66 : i32 to vector<5x5xi32>
    %301 = arith.andi %299, %300 : vector<5x5xi32>
    %c0_i32_67 = arith.constant 0 : i32
    %302 = vector.broadcast %c0_i32_67 : i32 to vector<5x5xi32>
    %303 = arith.cmpi slt, %299, %302 : vector<5x5xi32>
    %c0_i32_68 = arith.constant 0 : i32
    %304 = vector.broadcast %c0_i32_68 : i32 to vector<5x5xi32>
    %305 = arith.subi %304, %301 : vector<5x5xi32>
    %306 = arith.select %303, %305, %301 : vector<5x5xi1>, vector<5x5xi32>
    %c-8_i32_69 = arith.constant -8 : i32
    %307 = vector.broadcast %c-8_i32_69 : i32 to vector<5x5xi32>
    %308 = arith.andi %306, %307 : vector<5x5xi32>
    %309 = arith.ori %308, %251 : vector<5x5xi32>
    %cst_70 = arith.constant dense<-2147483648> : vector<5xi32>
    %310 = vector.multi_reduction <maxsi>, %309, %cst_70 [0] : vector<5x5xi32> to vector<5xi32>
    %311 = vector.shape_cast %310 : vector<5xi32> to vector<1x5xi32>
    %c7_i32_71 = arith.constant 7 : i32
    %312 = vector.broadcast %c7_i32_71 : i32 to vector<1x5xi32>
    %313 = arith.andi %311, %312 : vector<1x5xi32>
    %c4_i32_72 = arith.constant 4 : i32
    %314 = vector.broadcast %c4_i32_72 : i32 to vector<1x5xi32>
    %315 = arith.subi %314, %313 : vector<1x5xi32>
    %c-8_i32_73 = arith.constant -8 : i32
    %316 = vector.broadcast %c-8_i32_73 : i32 to vector<1x5xi32>
    %317 = arith.andi %311, %316 : vector<1x5xi32>
    %c0_i32_74 = arith.constant 0 : i32
    %318 = vector.broadcast %c0_i32_74 : i32 to vector<1x5xi32>
    %319 = arith.cmpi slt, %317, %318 : vector<1x5xi32>
    %c0_i32_75 = arith.constant 0 : i32
    %320 = vector.broadcast %c0_i32_75 : i32 to vector<1x5xi32>
    %321 = arith.subi %320, %317 : vector<1x5xi32>
    %322 = arith.select %319, %321, %317 : vector<1x5xi1>, vector<1x5xi32>
    %c0_i32_76 = arith.constant 0 : i32
    %323 = vector.broadcast %c0_i32_76 : i32 to vector<1x5xi32>
    %324 = arith.cmpi slt, %317, %323 : vector<1x5xi32>
    %c-2147483648_i32_77 = arith.constant -2147483648 : i32
    %325 = vector.broadcast %c-2147483648_i32_77 : i32 to vector<1x5xi32>
    %326 = arith.ori %322, %325 : vector<1x5xi32>
    %327 = arith.select %324, %326, %322 : vector<1x5xi1>, vector<1x5xi32>
    %328 = tpu.bitcast %327 : vector<1x5xi32> -> vector<1x5xf32>
    %329 = vector.extract_strided_slice %242 {offsets = [2, 0], sizes = [1, 5], strides = [1, 1]} : vector<6x5xf32> to vector<1x5xf32>
    %330 = arith.addf %328, %329 : vector<1x5xf32>
    %331 = vector.broadcast %330 : vector<1x5xf32> to vector<5x5xf32>
    %332 = arith.mulf %248, %331 : vector<5x5xf32>
    %cst_78 = arith.constant dense<0.000000e+00> : vector<5xf32>
    %333 = vector.multi_reduction <add>, %332, %cst_78 [1] : vector<5x5xf32> to vector<5xf32>
    %334 = vector.shape_cast %333 : vector<5xf32> to vector<5x1xf32>
    %335 = vector.broadcast %334 : vector<5x1xf32> to vector<5x5xf32>
    %336 = arith.addf %335, %243 : vector<5x5xf32>
    %337 = tpu.bitcast %336 : vector<5x5xf32> -> vector<5x5xi32>
    %c2147483647_i32_79 = arith.constant 2147483647 : i32
    %338 = vector.broadcast %c2147483647_i32_79 : i32 to vector<5x5xi32>
    %339 = arith.andi %337, %338 : vector<5x5xi32>
    %c0_i32_80 = arith.constant 0 : i32
    %340 = vector.broadcast %c0_i32_80 : i32 to vector<5x5xi32>
    %341 = arith.cmpi slt, %337, %340 : vector<5x5xi32>
    %c0_i32_81 = arith.constant 0 : i32
    %342 = vector.broadcast %c0_i32_81 : i32 to vector<5x5xi32>
    %343 = arith.subi %342, %339 : vector<5x5xi32>
    %344 = arith.select %341, %343, %339 : vector<5x5xi1>, vector<5x5xi32>
    %c-8_i32_82 = arith.constant -8 : i32
    %345 = vector.broadcast %c-8_i32_82 : i32 to vector<5x5xi32>
    %346 = arith.andi %344, %345 : vector<5x5xi32>
    %347 = arith.ori %346, %251 : vector<5x5xi32>
    %cst_83 = arith.constant dense<-2147483648> : vector<5xi32>
    %348 = vector.multi_reduction <maxsi>, %347, %cst_83 [0] : vector<5x5xi32> to vector<5xi32>
    %349 = vector.shape_cast %348 : vector<5xi32> to vector<1x5xi32>
    %c7_i32_84 = arith.constant 7 : i32
    %350 = vector.broadcast %c7_i32_84 : i32 to vector<1x5xi32>
    %351 = arith.andi %349, %350 : vector<1x5xi32>
    %c4_i32_85 = arith.constant 4 : i32
    %352 = vector.broadcast %c4_i32_85 : i32 to vector<1x5xi32>
    %353 = arith.subi %352, %351 : vector<1x5xi32>
    %c-8_i32_86 = arith.constant -8 : i32
    %354 = vector.broadcast %c-8_i32_86 : i32 to vector<1x5xi32>
    %355 = arith.andi %349, %354 : vector<1x5xi32>
    %c0_i32_87 = arith.constant 0 : i32
    %356 = vector.broadcast %c0_i32_87 : i32 to vector<1x5xi32>
    %357 = arith.cmpi slt, %355, %356 : vector<1x5xi32>
    %c0_i32_88 = arith.constant 0 : i32
    %358 = vector.broadcast %c0_i32_88 : i32 to vector<1x5xi32>
    %359 = arith.subi %358, %355 : vector<1x5xi32>
    %360 = arith.select %357, %359, %355 : vector<1x5xi1>, vector<1x5xi32>
    %c0_i32_89 = arith.constant 0 : i32
    %361 = vector.broadcast %c0_i32_89 : i32 to vector<1x5xi32>
    %362 = arith.cmpi slt, %355, %361 : vector<1x5xi32>
    %c-2147483648_i32_90 = arith.constant -2147483648 : i32
    %363 = vector.broadcast %c-2147483648_i32_90 : i32 to vector<1x5xi32>
    %364 = arith.ori %360, %363 : vector<1x5xi32>
    %365 = arith.select %362, %364, %360 : vector<1x5xi1>, vector<1x5xi32>
    %366 = tpu.bitcast %365 : vector<1x5xi32> -> vector<1x5xf32>
    %367 = vector.extract_strided_slice %242 {offsets = [3, 0], sizes = [1, 5], strides = [1, 1]} : vector<6x5xf32> to vector<1x5xf32>
    %368 = arith.addf %366, %367 : vector<1x5xf32>
    %369 = vector.broadcast %368 : vector<1x5xf32> to vector<5x5xf32>
    %370 = arith.mulf %248, %369 : vector<5x5xf32>
    %cst_91 = arith.constant dense<0.000000e+00> : vector<5xf32>
    %371 = vector.multi_reduction <add>, %370, %cst_91 [1] : vector<5x5xf32> to vector<5xf32>
    %372 = vector.shape_cast %371 : vector<5xf32> to vector<5x1xf32>
    %373 = vector.broadcast %372 : vector<5x1xf32> to vector<5x5xf32>
    %374 = arith.addf %373, %243 : vector<5x5xf32>
    %375 = tpu.bitcast %374 : vector<5x5xf32> -> vector<5x5xi32>
    %c2147483647_i32_92 = arith.constant 2147483647 : i32
    %376 = vector.broadcast %c2147483647_i32_92 : i32 to vector<5x5xi32>
    %377 = arith.andi %375, %376 : vector<5x5xi32>
    %c0_i32_93 = arith.constant 0 : i32
    %378 = vector.broadcast %c0_i32_93 : i32 to vector<5x5xi32>
    %379 = arith.cmpi slt, %375, %378 : vector<5x5xi32>
    %c0_i32_94 = arith.constant 0 : i32
    %380 = vector.broadcast %c0_i32_94 : i32 to vector<5x5xi32>
    %381 = arith.subi %380, %377 : vector<5x5xi32>
    %382 = arith.select %379, %381, %377 : vector<5x5xi1>, vector<5x5xi32>
    %c-8_i32_95 = arith.constant -8 : i32
    %383 = vector.broadcast %c-8_i32_95 : i32 to vector<5x5xi32>
    %384 = arith.andi %382, %383 : vector<5x5xi32>
    %385 = arith.ori %384, %251 : vector<5x5xi32>
    %cst_96 = arith.constant dense<-2147483648> : vector<5xi32>
    %386 = vector.multi_reduction <maxsi>, %385, %cst_96 [0] : vector<5x5xi32> to vector<5xi32>
    %387 = vector.shape_cast %386 : vector<5xi32> to vector<1x5xi32>
    %c7_i32_97 = arith.constant 7 : i32
    %388 = vector.broadcast %c7_i32_97 : i32 to vector<1x5xi32>
    %389 = arith.andi %387, %388 : vector<1x5xi32>
    %c4_i32_98 = arith.constant 4 : i32
    %390 = vector.broadcast %c4_i32_98 : i32 to vector<1x5xi32>
    %391 = arith.subi %390, %389 : vector<1x5xi32>
    %c-8_i32_99 = arith.constant -8 : i32
    %392 = vector.broadcast %c-8_i32_99 : i32 to vector<1x5xi32>
    %393 = arith.andi %387, %392 : vector<1x5xi32>
    %c0_i32_100 = arith.constant 0 : i32
    %394 = vector.broadcast %c0_i32_100 : i32 to vector<1x5xi32>
    %395 = arith.cmpi slt, %393, %394 : vector<1x5xi32>
    %c0_i32_101 = arith.constant 0 : i32
    %396 = vector.broadcast %c0_i32_101 : i32 to vector<1x5xi32>
    %397 = arith.subi %396, %393 : vector<1x5xi32>
    %398 = arith.select %395, %397, %393 : vector<1x5xi1>, vector<1x5xi32>
    %c0_i32_102 = arith.constant 0 : i32
    %399 = vector.broadcast %c0_i32_102 : i32 to vector<1x5xi32>
    %400 = arith.cmpi slt, %393, %399 : vector<1x5xi32>
    %c-2147483648_i32_103 = arith.constant -2147483648 : i32
    %401 = vector.broadcast %c-2147483648_i32_103 : i32 to vector<1x5xi32>
    %402 = arith.ori %398, %401 : vector<1x5xi32>
    %403 = arith.select %400, %402, %398 : vector<1x5xi1>, vector<1x5xi32>
    %404 = tpu.bitcast %403 : vector<1x5xi32> -> vector<1x5xf32>
    %405 = vector.extract_strided_slice %242 {offsets = [4, 0], sizes = [1, 5], strides = [1, 1]} : vector<6x5xf32> to vector<1x5xf32>
    %406 = arith.addf %404, %405 : vector<1x5xf32>
    %407 = vector.broadcast %406 : vector<1x5xf32> to vector<5x5xf32>
    %408 = arith.mulf %248, %407 : vector<5x5xf32>
    %cst_104 = arith.constant dense<0.000000e+00> : vector<5xf32>
    %409 = vector.multi_reduction <add>, %408, %cst_104 [1] : vector<5x5xf32> to vector<5xf32>
    %410 = vector.shape_cast %409 : vector<5xf32> to vector<5x1xf32>
    %411 = vector.broadcast %410 : vector<5x1xf32> to vector<5x5xf32>
    %412 = arith.addf %411, %243 : vector<5x5xf32>
    %413 = tpu.bitcast %412 : vector<5x5xf32> -> vector<5x5xi32>
    %c2147483647_i32_105 = arith.constant 2147483647 : i32
    %414 = vector.broadcast %c2147483647_i32_105 : i32 to vector<5x5xi32>
    %415 = arith.andi %413, %414 : vector<5x5xi32>
    %c0_i32_106 = arith.constant 0 : i32
    %416 = vector.broadcast %c0_i32_106 : i32 to vector<5x5xi32>
    %417 = arith.cmpi slt, %413, %416 : vector<5x5xi32>
    %c0_i32_107 = arith.constant 0 : i32
    %418 = vector.broadcast %c0_i32_107 : i32 to vector<5x5xi32>
    %419 = arith.subi %418, %415 : vector<5x5xi32>
    %420 = arith.select %417, %419, %415 : vector<5x5xi1>, vector<5x5xi32>
    %c-8_i32_108 = arith.constant -8 : i32
    %421 = vector.broadcast %c-8_i32_108 : i32 to vector<5x5xi32>
    %422 = arith.andi %420, %421 : vector<5x5xi32>
    %423 = arith.ori %422, %251 : vector<5x5xi32>
    %cst_109 = arith.constant dense<-2147483648> : vector<5xi32>
    %424 = vector.multi_reduction <maxsi>, %423, %cst_109 [0] : vector<5x5xi32> to vector<5xi32>
    %425 = vector.shape_cast %424 : vector<5xi32> to vector<1x5xi32>
    %c7_i32_110 = arith.constant 7 : i32
    %426 = vector.broadcast %c7_i32_110 : i32 to vector<1x5xi32>
    %427 = arith.andi %425, %426 : vector<1x5xi32>
    %c4_i32_111 = arith.constant 4 : i32
    %428 = vector.broadcast %c4_i32_111 : i32 to vector<1x5xi32>
    %429 = arith.subi %428, %427 : vector<1x5xi32>
    %c-8_i32_112 = arith.constant -8 : i32
    %430 = vector.broadcast %c-8_i32_112 : i32 to vector<1x5xi32>
    %431 = arith.andi %425, %430 : vector<1x5xi32>
    %c0_i32_113 = arith.constant 0 : i32
    %432 = vector.broadcast %c0_i32_113 : i32 to vector<1x5xi32>
    %433 = arith.cmpi slt, %431, %432 : vector<1x5xi32>
    %c0_i32_114 = arith.constant 0 : i32
    %434 = vector.broadcast %c0_i32_114 : i32 to vector<1x5xi32>
    %435 = arith.subi %434, %431 : vector<1x5xi32>
    %436 = arith.select %433, %435, %431 : vector<1x5xi1>, vector<1x5xi32>
    %c0_i32_115 = arith.constant 0 : i32
    %437 = vector.broadcast %c0_i32_115 : i32 to vector<1x5xi32>
    %438 = arith.cmpi slt, %431, %437 : vector<1x5xi32>
    %c-2147483648_i32_116 = arith.constant -2147483648 : i32
    %439 = vector.broadcast %c-2147483648_i32_116 : i32 to vector<1x5xi32>
    %440 = arith.ori %436, %439 : vector<1x5xi32>
    %441 = arith.select %438, %440, %436 : vector<1x5xi1>, vector<1x5xi32>
    %442 = tpu.bitcast %441 : vector<1x5xi32> -> vector<1x5xf32>
    %443 = vector.extract_strided_slice %242 {offsets = [5, 0], sizes = [1, 5], strides = [1, 1]} : vector<6x5xf32> to vector<1x5xf32>
    %444 = arith.addf %442, %443 : vector<1x5xf32>
    %c0_117 = arith.constant 0 : index
    %c0_118 = arith.constant 0 : index
    %445 = vector.load %arg9[%c0_117, %c0_118] : memref<1x5xf32, #tpu.memory_space<vmem>>, vector<1x5xf32>
    %446 = arith.addf %444, %445 : vector<1x5xf32>
    %447 = tpu.bitcast %446 : vector<1x5xf32> -> vector<1x5xi32>
    %c2147483647_i32_119 = arith.constant 2147483647 : i32
    %448 = vector.broadcast %c2147483647_i32_119 : i32 to vector<1x5xi32>
    %449 = arith.andi %447, %448 : vector<1x5xi32>
    %c0_i32_120 = arith.constant 0 : i32
    %450 = vector.broadcast %c0_i32_120 : i32 to vector<1x5xi32>
    %451 = arith.cmpi slt, %447, %450 : vector<1x5xi32>
    %c0_i32_121 = arith.constant 0 : i32
    %452 = vector.broadcast %c0_i32_121 : i32 to vector<1x5xi32>
    %453 = arith.subi %452, %449 : vector<1x5xi32>
    %454 = arith.select %451, %453, %449 : vector<1x5xi1>, vector<1x5xi32>
    %c-8_i32_122 = arith.constant -8 : i32
    %455 = vector.broadcast %c-8_i32_122 : i32 to vector<1x5xi32>
    %456 = arith.andi %454, %455 : vector<1x5xi32>
    %c4_i32_123 = arith.constant 4 : i32
    %457 = vector.broadcast %c4_i32_123 : i32 to vector<1x5xi32>
    %458 = arith.subi %457, %249 : vector<1x5xi32>
    %459 = arith.ori %456, %458 : vector<1x5xi32>
    %cst_124 = arith.constant dense<-2147483648> : vector<1xi32>
    %460 = vector.multi_reduction <maxsi>, %459, %cst_124 [1] : vector<1x5xi32> to vector<1xi32>
    %461 = vector.shape_cast %460 : vector<1xi32> to vector<1x1xi32>
    %c7_i32_125 = arith.constant 7 : i32
    %462 = vector.broadcast %c7_i32_125 : i32 to vector<1x1xi32>
    %463 = arith.andi %461, %462 : vector<1x1xi32>
    %c4_i32_126 = arith.constant 4 : i32
    %464 = vector.broadcast %c4_i32_126 : i32 to vector<1x1xi32>
    %465 = arith.subi %464, %463 : vector<1x1xi32>
    %466 = tpu.iota {dimensions = array<i32: 1>} : vector<1x128xi32>
    %c5_i32_127 = arith.constant 5 : i32
    %467 = vector.broadcast %c5_i32_127 : i32 to vector<1x128xi32>
    %468 = arith.cmpi eq, %466, %467 : vector<1x128xi32>
    %c0_i32_128 = arith.constant 0 : i32
    %469 = vector.shape_cast %465 : vector<1x1xi32> to vector<1x1xi32>
    %470 = vector.broadcast %469 : vector<1x1xi32> to vector<1x128xi32>
    %471 = vector.broadcast %c0_i32_128 : i32 to vector<1x128xi32>
    %472 = arith.select %468, %470, %471 : vector<1x128xi1>, vector<1x128xi32>
    %473 = vector.broadcast %465 : vector<1x1xi32> to vector<1x5xi32>
    %474 = arith.cmpi eq, %249, %473 : vector<1x5xi32>
    %c0_i32_129 = arith.constant 0 : i32
    %475 = vector.broadcast %c0_i32_129 : i32 to vector<1x5xi32>
    %476 = arith.select %474, %429, %475 : vector<1x5xi1>, vector<1x5xi32>
    %cst_130 = arith.constant dense<0> : vector<1xi32>
    %477 = vector.multi_reduction <add>, %476, %cst_130 [1] : vector<1x5xi32> to vector<1xi32>
    %478 = vector.shape_cast %477 : vector<1xi32> to vector<1x1xi32>
    %c4_i32_131 = arith.constant 4 : i32
    %479 = vector.broadcast %c4_i32_131 : i32 to vector<1x128xi32>
    %480 = arith.cmpi eq, %466, %479 : vector<1x128xi32>
    %481 = vector.shape_cast %478 : vector<1x1xi32> to vector<1x1xi32>
    %482 = vector.broadcast %481 : vector<1x1xi32> to vector<1x128xi32>
    %483 = arith.select %480, %482, %472 : vector<1x128xi1>, vector<1x128xi32>
    %484 = vector.broadcast %478 : vector<1x1xi32> to vector<1x5xi32>
    %485 = arith.cmpi eq, %249, %484 : vector<1x5xi32>
    %c0_i32_132 = arith.constant 0 : i32
    %486 = vector.broadcast %c0_i32_132 : i32 to vector<1x5xi32>
    %487 = arith.select %485, %391, %486 : vector<1x5xi1>, vector<1x5xi32>
    %cst_133 = arith.constant dense<0> : vector<1xi32>
    %488 = vector.multi_reduction <add>, %487, %cst_133 [1] : vector<1x5xi32> to vector<1xi32>
    %489 = vector.shape_cast %488 : vector<1xi32> to vector<1x1xi32>
    %c3_i32_134 = arith.constant 3 : i32
    %490 = vector.broadcast %c3_i32_134 : i32 to vector<1x128xi32>
    %491 = arith.cmpi eq, %466, %490 : vector<1x128xi32>
    %492 = vector.shape_cast %489 : vector<1x1xi32> to vector<1x1xi32>
    %493 = vector.broadcast %492 : vector<1x1xi32> to vector<1x128xi32>
    %494 = arith.select %491, %493, %483 : vector<1x128xi1>, vector<1x128xi32>
    %495 = vector.broadcast %489 : vector<1x1xi32> to vector<1x5xi32>
    %496 = arith.cmpi eq, %249, %495 : vector<1x5xi32>
    %c0_i32_135 = arith.constant 0 : i32
    %497 = vector.broadcast %c0_i32_135 : i32 to vector<1x5xi32>
    %498 = arith.select %496, %353, %497 : vector<1x5xi1>, vector<1x5xi32>
    %cst_136 = arith.constant dense<0> : vector<1xi32>
    %499 = vector.multi_reduction <add>, %498, %cst_136 [1] : vector<1x5xi32> to vector<1xi32>
    %500 = vector.shape_cast %499 : vector<1xi32> to vector<1x1xi32>
    %c2_i32_137 = arith.constant 2 : i32
    %501 = vector.broadcast %c2_i32_137 : i32 to vector<1x128xi32>
    %502 = arith.cmpi eq, %466, %501 : vector<1x128xi32>
    %503 = vector.shape_cast %500 : vector<1x1xi32> to vector<1x1xi32>
    %504 = vector.broadcast %503 : vector<1x1xi32> to vector<1x128xi32>
    %505 = arith.select %502, %504, %494 : vector<1x128xi1>, vector<1x128xi32>
    %506 = vector.broadcast %500 : vector<1x1xi32> to vector<1x5xi32>
    %507 = arith.cmpi eq, %249, %506 : vector<1x5xi32>
    %c0_i32_138 = arith.constant 0 : i32
    %508 = vector.broadcast %c0_i32_138 : i32 to vector<1x5xi32>
    %509 = arith.select %507, %315, %508 : vector<1x5xi1>, vector<1x5xi32>
    %cst_139 = arith.constant dense<0> : vector<1xi32>
    %510 = vector.multi_reduction <add>, %509, %cst_139 [1] : vector<1x5xi32> to vector<1xi32>
    %511 = vector.shape_cast %510 : vector<1xi32> to vector<1x1xi32>
    %c1_i32_140 = arith.constant 1 : i32
    %512 = vector.broadcast %c1_i32_140 : i32 to vector<1x128xi32>
    %513 = arith.cmpi eq, %466, %512 : vector<1x128xi32>
    %514 = vector.shape_cast %511 : vector<1x1xi32> to vector<1x1xi32>
    %515 = vector.broadcast %514 : vector<1x1xi32> to vector<1x128xi32>
    %516 = arith.select %513, %515, %505 : vector<1x128xi1>, vector<1x128xi32>
    %517 = vector.broadcast %511 : vector<1x1xi32> to vector<1x5xi32>
    %518 = arith.cmpi eq, %249, %517 : vector<1x5xi32>
    %c0_i32_141 = arith.constant 0 : i32
    %519 = vector.broadcast %c0_i32_141 : i32 to vector<1x5xi32>
    %520 = arith.select %518, %277, %519 : vector<1x5xi1>, vector<1x5xi32>
    %cst_142 = arith.constant dense<0> : vector<1xi32>
    %521 = vector.multi_reduction <add>, %520, %cst_142 [1] : vector<1x5xi32> to vector<1xi32>
    %522 = vector.shape_cast %521 : vector<1xi32> to vector<1x1xi32>
    %c0_i32_143 = arith.constant 0 : i32
    %523 = vector.broadcast %c0_i32_143 : i32 to vector<1x128xi32>
    %524 = arith.cmpi eq, %466, %523 : vector<1x128xi32>
    %525 = vector.shape_cast %522 : vector<1x1xi32> to vector<1x1xi32>
    %526 = vector.broadcast %525 : vector<1x1xi32> to vector<1x128xi32>
    %527 = arith.select %524, %526, %516 : vector<1x128xi1>, vector<1x128xi32>
    %528 = vector.shape_cast %527 : vector<1x128xi32> to vector<1x1x128xi32>
    %c0_144 = arith.constant 0 : index
    %c0_145 = arith.constant 0 : index
    %c0_146 = arith.constant 0 : index
    %529 = vector.load %arg11[%c0_144, %c0_145, %c0_146] : memref<1x1x128xi32, #tpu.memory_space<vmem>>, vector<1x1x128xi32>
    tpu.vector_store %arg11[%c0_144, %c0_145, %c0_146], %528 {strides = array<i32>} : memref<1x1x128xi32, #tpu.memory_space<vmem>>, vector<1x1x128xi32>,
    return
  }
  func.func @transform_0(%arg0: i32, %arg1: memref<32xi32, #tpu.memory_space<smem>>) -> (i32, i32) {
    %c0_i32 = arith.constant 0 : i32
    %c0_i32_0 = arith.constant 0 : i32
    %c0_i32_1 = arith.constant 0 : i32
    return %c0_i32, %c0_i32_0 : i32, i32
  }
  func.func @transform_1(%arg0: i32, %arg1: memref<32xi32, #tpu.memory_space<smem>>) -> (i32, i32) {
    %c0_i32 = arith.constant 0 : i32
    %c0_i32_0 = arith.constant 0 : i32
    %c0_i32_1 = arith.constant 0 : i32
    return %c0_i32, %c0_i32_0 : i32, i32
  }
  func.func @transform_2(%arg0: i32, %arg1: memref<32xi32, #tpu.memory_space<smem>>) -> (i32, i32) {
    %c0_i32 = arith.constant 0 : i32
    %c0_i32_0 = arith.constant 0 : i32
    %c0_i32_1 = arith.constant 0 : i32
    return %c0_i32, %c0_i32_0 : i32, i32
  }
  func.func @transform_3(%arg0: i32, %arg1: memref<32xi32, #tpu.memory_space<smem>>) -> (i32, i32) {
    %c0_i32 = arith.constant 0 : i32
    %c0_i32_0 = arith.constant 0 : i32
    %c0_i32_1 = arith.constant 0 : i32
    return %c0_i32, %c0_i32_0 : i32, i32
  }
  func.func @transform_4(%arg0: i32, %arg1: memref<32xi32, #tpu.memory_space<smem>>) -> (i32, i32) {
    %c0_i32 = arith.constant 0 : i32
    %c0_i32_0 = arith.constant 0 : i32
    %c0_i32_1 = arith.constant 0 : i32
    return %c0_i32, %c0_i32_0 : i32, i32
  }
  func.func @transform_5(%arg0: i32, %arg1: memref<32xi32, #tpu.memory_space<smem>>) -> (i32, i32) {
    %c0_i32 = arith.constant 0 : i32
    %c0_i32_0 = arith.constant 0 : i32
    %c0_i32_1 = arith.constant 0 : i32
    return %c0_i32, %c0_i32_0 : i32, i32
  }
  func.func @transform_6(%arg0: i32, %arg1: memref<32xi32, #tpu.memory_space<smem>>) -> (i32, i32) {
    %c0_i32 = arith.constant 0 : i32
    %c0_i32_0 = arith.constant 0 : i32
    %c0_i32_1 = arith.constant 0 : i32
    return %c0_i32, %c0_i32_0 : i32, i32
  }
  func.func @transform_7(%arg0: i32, %arg1: memref<32xi32, #tpu.memory_space<smem>>) -> (i32, i32) {
    %c0_i32 = arith.constant 0 : i32
    %c0_i32_0 = arith.constant 0 : i32
    %c0_i32_1 = arith.constant 0 : i32
    return %c0_i32, %c0_i32_0 : i32, i32
  }
  func.func @transform_8(%arg0: i32, %arg1: memref<32xi32, #tpu.memory_space<smem>>) -> (i32, i32) {
    %c0_i32 = arith.constant 0 : i32
    %c0_i32_0 = arith.constant 0 : i32
    %c0_i32_1 = arith.constant 0 : i32
    return %c0_i32, %c0_i32_0 : i32, i32
  }
  func.func @transform_9(%arg0: i32, %arg1: memref<32xi32, #tpu.memory_space<smem>>) -> (i32, i32, i32) {
    %c0_i32 = arith.constant 0 : i32
    %c0_i32_0 = arith.constant 0 : i32
    %c0_i32_1 = arith.constant 0 : i32
    return %arg0, %c0_i32, %c0_i32_0 : i32, i32, i32
  }
}

</mosaic_0001>

<bundles_post_ra>
// kernel: tpu_custom_call.1
= control target key start
LH: loop header
LB: loop body
LE: loop exit
PB: predicated region body
PF: predicated region fallthrough
CT: control target
= control target key end

     0   :  { %s2819_s0 = inlined_call_operand.vmem [shape: s32[32], index: 0, kind: input, shape index: {}]   ;;  %s2820_s1 = inlined_call_operand.vmem [shape: f32[50,16], index: 1, kind: input, shape index: {}]   ;;  %s2821_s2 = inlined_call_operand.vmem [shape: f32[32,128], index: 2, kind: input, shape index: {}]   ;;  %s2822_s3 = inlined_call_operand.vmem [shape: f32[32,128], index: 3, kind: input, shape index: {}]   ;;  %s2823_s4 = inlined_call_operand.vmem [shape: f32[1,128], index: 4, kind: input, shape index: {}]   ;;  %s2824_s5 = inlined_call_operand.vmem [shape: f32[32,5], index: 5, kind: input, shape index: {}]   ;;  %s2825_s6 = inlined_call_operand.vmem [shape: f32[1,5], index: 6, kind: input, shape index: {}]   ;;  %s2826_s7 = inlined_call_operand.vmem [shape: f32[1,5], index: 7, kind: input, shape index: {}]   ;;  %s2827_s8 = inlined_call_operand.vmem [shape: f32[1,5], index: 8, kind: input, shape index: {}]   ;;  %s2828_s9 = inlined_call_operand.vmem [shape: f32[5,5], index: 9, kind: input, shape index: {}]   ;;  %s2829_s10 = inlined_call_operand.hbm [shape: s32[4,1,128], index: 10, kind: output, shape index: {}]  }
   0x1   :  { %s15_s15 = sshll.u32 %s2819_s0, 4  ;;  %s16_s15 = int_to_ptr.vmem [resolvable:$true] %s15_s15 }
   0x2   :  { %s2180_s16 = scalar_lea.vmem %s16_s15, 16  ;;  %p2185_p1 = scmp.lt.s32.totalorder %s16_s15, %s16_s15 }
   0x3   :  { %p2181_p0 = scmp.ne.s32.totalorder %s16_s15, %s2180_s16  ;;  %p2186_p2 = scmp.lt.s32.totalorder %s2180_s16, %s2180_s16 }
   0x5   :  { %p2187_p3 = por %p2186_p2, %p2185_p1 }
   0x7   :  { %p2188_p4 = pnand %p2187_p3, %p2181_p0 }
   0x9   :  { %2191 = shalt.err (!%p2188_p4)  }
   0xa   :  { %s2256_s17 = smov [#allocation3]  }
   0xb   :  { %18 = dma.vmem_to_smem %s16_s15, 16, %s2256_s17, [#allocation2] }
   0xc   :  { %2234 = dma.done.wait [#allocation2], 16 }
   0xd   :  { %2235 = vsyncadd [#allocation2], 4294967280 }
   0xe   :  { %20 = sfence }
   0xf   :  { %21 = vsyncpa [#allocation5], 0 }
  0x10   :  { %23 = vsyncpa [#allocation5 + $0x1], 0  ;;  %s2322_s18 = smov 0   ;;  %s2324_s19 = smov 0  }
  0x11   :  { %s2326_s0 = smov 0   ;;  %s2328_s20 = smov 0  }
  0x12 LB: > { %2836 = sst [smem:[#allocation8_spill]] %s2242_s18  ;;  %s2343_s21 = sadd.s32 4294967295, %s2254_s20   ;;  %s2254_s20 = sphi %s2328_s20, %s2847_s20   ;;  %s2250_s0 = sphi %s2326_s0, %s2849_s0   ;;  %s2246_s19 = sphi %s2324_s19, %s2851_s19   ;;  %s2242_s18 = sphi %s2322_s18, %s2850_s18  }
  0x13   : > { %2837 = sst [smem:[#allocation9_spill]] %s2250_s0  ;;  %s1877_s22 = sadd.s32 4294967294, %s2254_s20  }
  0x14   : > { %2838 = sst [smem:[#allocation10_spill]] %s2254_s20  ;;  %s2347_s23 = sadd.s32 1, %s2254_s20  }
  0x15   : > { %2839 = sst [smem:[#allocation11_spill]] %s2347_s23  ;;  %s225_s24 = sadd.s32 1, %s2250_s0 }
  0x16   : > { %s222_s25 = ssub.s32 %s2254_s20, %s2347_s23  ;;  %p235_p5 = scmp.ne.s32.totalorder %s2250_s0, %s2246_s19 }
  0x17   : > { %p223_p6 = scmp.eq.s32.totalorder %s222_s25, 0  ;;  %p236_p7 = scmp.eq.s32.totalorder %s2343_s21, 3 }
  0x18   : > { %p241_p8 = scmp.ne.s32.totalorder %s2246_s19, %s2242_s18  ;;  %p242_p9 = scmp.eq.s32.totalorder %s1877_s22, 3 }
  0x19   : > { %s2358_s26 = scalar_select %p223_p6, %s2250_s0, %s225_s24  }
  0x1a   : > { %p2360_p10 = por %p236_p7, %p235_p5  ;;  %p2364_p11 = por %p242_p9, %p241_p8 }
  0x1b   : > { %2840 = sst [smem:[#allocation12_spill]] %s2358_s26  ;;  %p1879_p12 = scmp.ge.s32.totalorder %s2254_s20, 1 }
  0x1c   : > { %s2842_s28 = scalar_select %p2364_p11, 1, 0 }
  0x1d   : > { %p287_p13 = scmp.lt.s32.totalorder %s2254_s20, 5 }
  0x1e   : > { %2843 = sst [smem:[#allocation13_spill]] %s2842_s28 }
  0x1f   : > { %p288_p0 = pnand %p1879_p12, %p287_p13 }
  0x20   : > { %s2371_s29 = sshll.u32 (!%p288_p0), %s2343_s21, 3  ;;  %s2261_s18 = smov (!%p288_p0), 64  }
  0x21   : > { %291 = sbr.rel (%p288_p0) target bundleno = 7888 (0x1ed0), region = 56  ;;  %s2374_s30 = sld [smem:[#allocation3 + %s2371_s29]] (!%p288_p0) }
  0x22   : > { %s321_s11 = sadd.s32 (!%p288_p0), 1, %s2371_s29  ;;  %s325_s13 = sadd.s32 (!%p288_p0), 2, %s2371_s29 }
  0x23   : > { %s2377_s12 = sld [smem:[#allocation3 + %s321_s11]] (!%p288_p0)  ;;  %s329_s11 = sadd.s32 (!%p288_p0), 3, %s2371_s29 }
  0x24   : > { %s2393_s25 = sld [smem:[#allocation3 + %s325_s13]] (!%p288_p0)  ;;  %s333_s16 = sadd.s32 (!%p288_p0), 4, %s2371_s29 }
  0x25   : > { %s2402_s15 = sld [smem:[#allocation3 + %s329_s11]] (!%p288_p0)  ;;  %s337_s11 = sadd.s32 (!%p288_p0), 5, %s2371_s29 }
  0x26   : > { %v2257_v0 = vmov 0.0   ;;  %v415_v1 = vld [vmem:[%s2821_s2 + $0x18] sm:$0xff]  ;;  %v414_v3 = vld [vmem:[%s2821_s2 + $0x10] sm:$0xff]  ;;  %v413_v5 = vld [vmem:[%s2821_s2 + $0x8] sm:$0xff]  ;;  %s2415_s26 = sld [smem:[#allocation3 + %s333_s16]]  ;;  %s341_s0 = sadd.s32 6, %s2371_s29 }
  0x27   : > { %1960 = vmatprep.subr.mxu0 %v2257_v0  ;;  %1971 = vmatprep.subr.mxu1 %v2257_v0  ;;  %v2388_v2 = vld [vmem:[%s2822_s3 + $0x18] sm:$0xff]  ;;  %v2400_v4 = vld [vmem:[%s2822_s3 + $0x10] sm:$0xff]  ;;  %v2413_v6 = vld [vmem:[%s2822_s3 + $0x8] sm:$0xff]  ;;  %s2419_s14 = sld [smem:[#allocation3 + %s337_s11]]  ;;  %s319_s22 = scalar_lea.vmem %s2820_s1, %s2374_s30  ;;  %vm370_vm0 = vcmask 1040384   ;;  %vm2258_vm1 = vmmov 0  }
  0x28   : > { %1961 = vmatpush3.msra.mxu0 %v415_v1  ;;  %1972 = vmatpush3.msra.mxu1 %v2388_v2  ;;  %s2428_s24 = sld [smem:[#allocation3 + %s341_s0]]  ;;  %s345_s28 = sadd.s32 7, %s2371_s29  ;;  %v412_v10 = vld [vmem:[%s2821_s2] sm:$0xff]  ;;  %vm372_vm2 = vcmask 1041408   ;;  %vm374_vm3 = vcmask 1042432   ;;  %vm376_vm4 = vcmask 1043456  }
  0x29   : > { %1962 = vmatprep.subr.mxu0 %v2257_v0  ;;  %1973 = vmatprep.subr.mxu1 %v2257_v0  ;;  %s323_s11 = scalar_lea.vmem %s2820_s1, %s2377_s12  ;;  %s2444_s30 = sld [smem:[#allocation3 + %s345_s28]]  ;;  %v320_v11 = vld [vmem:[%s319_s22] sm:$0x1]  ;;  %vm378_vm5 = vcmask 1044480   ;;  %vm380_vm6 = vcmask 1045504   ;;  %vm382_vm7 = vcmask 1046528  }
  0x2a   : > { %1963 = vmatpush3.msra.mxu0 %v414_v3  ;;  %1974 = vmatpush3.msra.mxu1 %v2400_v4  ;;  %v2438_v7 = vld [vmem:[%s323_s11] sm:$0x1]  ;;  %s327_s0 = scalar_lea.vmem %s2820_s1, %s2393_s25  ;;  %v397_v38 = vrot.slane %v320_v11, 1  ;;  %vm410_vm8 = vcmask 130048   ;;  %vm423_vm9 = vcmask 261120   ;;  %s2260_s12 = smov 32  }
  0x2b   : > { %1964 = vmatprep.subr.mxu0 %v2257_v0  ;;  %1975 = vmatprep.subr.mxu1 %v2257_v0  ;;  %v2446_v8 = vld [vmem:[%s327_s0] sm:$0x1]  ;;  %s331_s23 = scalar_lea.vmem %s2820_s1, %s2402_s15  ;;  %v350_v9 = vrot.slane %v2438_v7, 7  ;;  %v394_v36 = vrot.slane %v2438_v7, 2  ;;  %vm1515_vm12 = vcmask 36864  }
  0x2c   : > { %1965 = vmatpush3.msra.mxu0 %v413_v5  ;;  %1976 = vmatpush3.msra.mxu1 %v2413_v6  ;;  %v332_v12 = vld [vmem:[%s331_s23] sm:$0x1]  ;;  %s335_s28 = scalar_lea.vmem %s2820_s1, %s2415_s26  ;;  %v353_v13 = vrot.slane %v2446_v8, 6  ;;  %v392_v32 = vrot.slane %v2446_v8, 3 }
  0x2d   : > { %1966 = vmatprep.subr.mxu0 %v2257_v0  ;;  %1977 = vmatprep.subr.mxu1 %v2257_v0  ;;  %v2466_v14 = vld [vmem:[%s2822_s3] sm:$0xff]  ;;  %s339_s11 = scalar_lea.vmem %s2820_s1, %s2419_s14  ;;  %v356_v16 = vrot.slane %v332_v12, 5  ;;  %v371_v17 = vsel %vm370_vm0, %v320_v11, %v350_v9  ;;  %v390_v30 = vrot.slane %v332_v12, 4 }
  0x2e   : > { %1967 = vmatpush3.msra.mxu0 %v412_v10  ;;  %1968 = vmatprep.mubr.msk.f32.mxu0 %vm2258_vm1, %v2257_v0  ;;  %v336_v15 = vld [vmem:[%s335_s28] sm:$0x1]  ;;  %s343_s0 = scalar_lea.vmem %s2820_s1, %s2428_s24  ;;  %v373_v19 = vsel %vm372_vm2, %v371_v17, %v353_v13 }
  0x2f   : > { %1978 = vmatpush3.msra.mxu1 %v2466_v14  ;;  %1979 = vmatprep.mubr.msk.f32.mxu1 %vm2258_vm1, %v2257_v0  ;;  %v340_v18 = vld [vmem:[%s339_s11] sm:$0x1]  ;;  %v359_v20 = vrot.slane %v336_v15, 4  ;;  %v375_v23 = vsel %vm374_vm3, %v373_v19, %v356_v16  ;;  %s347_s17 = scalar_lea.vmem %s2820_s1, %s2444_s30  ;;  %v388_v26 = vrot.slane %v336_v15, 5  ;;  %s2259_s30 = smov 16  }
  0x30   : > { %1980 = vmatmul.mubr.f32.vlgmr.msra.gmra.mxu1 %v2257_v0  ;;  %1982 = vmatprep.subr.mxu0 %v2257_v0  ;;  %v344_v21 = vld [vmem:[%s343_s0] sm:$0x1]  ;;  %v386_v22 = vrot.slane %v340_v18, 6  ;;  %v362_v24 = vrot.slane %v340_v18, 3 }
  0x31   : > { %1993 = vmatprep.subr.mxu1 %v2257_v0  ;;  %2001 = vmatprep.mubr.msk.f32.mxu1 %vm2258_vm1, %v2257_v0  ;;  %v384_v25 = vrot.slane %v344_v21, 7  ;;  %v365_v27 = vrot.slane %v344_v21, 2  ;;  %v377_v28 = vsel %vm376_vm4, %v375_v23, %v359_v20  ;;  %v348_v29 = vld [vmem:[%s347_s17] sm:$0x1] }
  0x32   : > { %1994 = vmatpush3.msra.mxu1 %v2388_v2  ;;  %v379_v31 = vsel %vm378_vm5, %v377_v28, %v362_v24  ;;  %v368_v34 = vrot.slane %v348_v29, 1  ;;  %v1881_v49 = vld [vmem:[%s2823_s4] ss:$0 sm:$0xff] }
  0x33   : > { %1995 = vmatprep.subr.mxu1 %v2257_v0  ;;  %v399_v33 = vsel %vm370_vm0, %v348_v29, %v384_v25  ;;  %v381_v35 = vsel %vm380_vm6, %v379_v31, %v365_v27 }
  0x34   : > { %1996 = vmatpush3.msra.mxu1 %v2400_v4  ;;  %v400_v37 = vsel %vm372_vm2, %v399_v33, %v386_v22  ;;  %v383_v40 = vsel %vm382_vm7, %v381_v35, %v368_v34 }
  0x35   : > { %1997 = vmatprep.subr.mxu1 %v2257_v0  ;;  %v401_v39 = vsel %vm374_vm3, %v400_v37, %v388_v26 }
  0x36   : > { %1998 = vmatpush3.msra.mxu1 %v2413_v6  ;;  %v402_v41 = vsel %vm376_vm4, %v401_v39, %v390_v30 }
  0x37   : > { %1999 = vmatprep.subr.mxu1 %v2257_v0  ;;  %v403_v42 = vsel %vm378_vm5, %v402_v41, %v392_v32 }
  0x38   : > { %2000 = vmatpush3.msra.mxu1 %v2466_v14  ;;  %v404_v43 = vsel %vm380_vm6, %v403_v42, %v394_v36 }
  0x39   : > { %2015 = vmatprep.subr.mxu1 %v2257_v0  ;;  %v405_v44 = vsel %vm382_vm7, %v404_v43, %v397_v38 }
  0x3a   : > { %407 = vrot.lane.b32.xlu0 %v405_v44, %s2259_s30 }
  0xac   : > { %v408_v45 = vpop.permute.xlu0 %407 }
  0xad   : > { %v411_v46 = vsel %vm410_vm8, %v383_v40, %v408_v45 }
  0xae   : > { %1969 = vmatmul.mubr.msk.f32.vlgmr.msra.gmra.mxu0 %vm423_vm9, %v411_v46 }
  0xaf   : > { %1983 = vmatpush3.msra.mxu0 %v2388_v2  ;;  %1990 = vmatprep.mubr.msk.f32.mxu0 %vm2258_vm1, %v2257_v0 }
  0xb0   : > { %1984 = vmatprep.subr.mxu0 %v2257_v0 }
  0xb1   : > { %1985 = vmatpush3.msra.mxu0 %v2400_v4 }
  0xb2   : > { %1986 = vmatprep.subr.mxu0 %v2257_v0 }
  0xb3   : > { %1987 = vmatpush3.msra.mxu0 %v2413_v6 }
  0xb4   : > { %1988 = vmatprep.subr.mxu0 %v2257_v0 }
  0xb5   : > { %1989 = vmatpush3.msra.mxu0 %v2466_v14 }
  0xb6   : > { %2004 = vmatprep.subr.mxu0 %v2257_v0 }
  0xf0   : > { %v570_v47 = vpop.f32.mrf.mxu1 }
  0xf2   : > { %v1981_v48 = vpop.f32.mrf.mxu1 }
 0x16e   : > { %v493_v50 = vpop.f32.mrf.mxu0 }
 0x16f   : > { %v2526_v51 = vadd.f32 %v1881_v49, %v493_v50 }
 0x170   : > { %v1970_v52 = vpop.f32.mrf.mxu0 }
 0x171   : > { %v574_v53 = vadd.f32 %v570_v47, %v2526_v51 }
 0x173   : > { %2116 = vtanh.f32 %v574_v53  ;;  %v1883_v55 = vmul.f32 -1.442695, %v574_v53 }
 0x175   : > { %2118 = vpow2.f32 %v1883_v55 }
 0x180   : > { %v2117_v54 = vpop.eup %2116 }
 0x181   : > { %584 = vrot.lane.b32.xlu0 %v2117_v54, %s2260_s12 }
 0x182   : > { %v2119_v56 = vpop.eup %2118 }
 0x183   : > { %v578_v57 = vadd.f32 1.0, %v2119_v56 }
 0x185   : > { %2120 = vrcp.f32 %v578_v57 }
 0x192   : > { %v2121_v58 = vpop.eup %2120 }
 0x193   : > { %v582_v61 = vmul.f32 0.0, %v2121_v58 }
 0x1f3   : > { %v585_v59 = vpop.permute.xlu0 %584 }
 0x1f4   : > { %v587_v60 = vmul.f32 %v2121_v58, %v585_v59 }
 0x1f6   : > { %589 = vrot.lane.b32.xlu1 %v587_v60, %s2260_s12 }
 0x268   : > { %v590_v62 = vpop.permute.xlu1 %589 }
 0x269   : > { %v592_v63 = vadd.f32 %v590_v62, %v582_v61 }
 0x26b   : > { %2122 = vtanh.f32 %v592_v63  ;;  %v686_v20 = vrot.slane %v592_v63, 7 }
 0x278   : > { %v2123_v1 = vpop.eup %2122 }
 0x279   : > { %595 = vrot.lane.b32.xlu1 %v2123_v1, %s2260_s12 }
 0x2eb   : > { %v596_v3 = vpop.permute.xlu1 %595 }
 0x2ec   : > { %v598_v5 = vmul.f32 %v2121_v58, %v596_v3 }
 0x2ee   : > { %600 = vrot.lane.b32.xlu0 %v598_v5, %s2261_s18 }
 0x360   : > { %v2533_v7 = vpop.permute.xlu0 %600 }
 0x361   : > { %1991 = vmatmul.mubr.msk.f32.vlgmr.msra.gmra.mxu0 %vm423_vm9, %v2533_v7 }
 0x362   : > { %2005 = vmatpush3.msra.mxu0 %v2388_v2  ;;  %2012 = vmatprep.mubr.msk.f32.mxu0 %vm2258_vm1, %v2257_v0 }
 0x363   : > { %2006 = vmatprep.subr.mxu0 %v2257_v0 }
 0x364   : > { %2007 = vmatpush3.msra.mxu0 %v2400_v4 }
 0x365   : > { %2008 = vmatprep.subr.mxu0 %v2257_v0 }
 0x366   : > { %2009 = vmatpush3.msra.mxu0 %v2413_v6 }
 0x367   : > { %2010 = vmatprep.subr.mxu0 %v2257_v0 }
 0x368   : > { %2011 = vmatpush3.msra.mxu0 %v2466_v14 }
 0x369   : > { %2026 = vmatprep.subr.mxu0 %v2257_v0 }
 0x421   : > { %v670_v8 = vpop.f32.mrf.mxu0 }
 0x422   : > { %v675_v9 = vrot.slane %v670_v8, 7 }
 0x423   : > { %v1992_v10 = vpop.f32.mrf.mxu0 }
 0x424   : > { %v677_v11 = vadd.f32 %v675_v9, %v2526_v51 }
 0x426   : > { %2124 = vtanh.f32 %v677_v11  ;;  %v1885_v13 = vmul.f32 -1.442695, %v677_v11 }
 0x428   : > { %2126 = vpow2.f32 %v1885_v13 }
 0x433   : > { %v2125_v12 = vpop.eup %2124 }
 0x434   : > { %690 = vrot.lane.b32.xlu1 %v2125_v12, %s2260_s12 }
 0x435   : > { %v2127_v15 = vpop.eup %2126 }
 0x436   : > { %v681_v16 = vadd.f32 1.0, %v2127_v15 }
 0x438   : > { %2128 = vrcp.f32 %v681_v16 }
 0x445   : > { %v2129_v17 = vpop.eup %2128 }
 0x446   : > { %v688_v21 = vmul.f32 %v2129_v17, %v686_v20 }
 0x4a6   : > { %v691_v18 = vpop.permute.xlu1 %690 }
 0x4a7   : > { %v693_v19 = vmul.f32 %v2129_v17, %v691_v18 }
 0x4a9   : > { %695 = vrot.lane.b32.xlu0 %v693_v19, %s2260_s12 }
 0x51b   : > { %v696_v22 = vpop.permute.xlu0 %695 }
 0x51c   : > { %v698_v23 = vadd.f32 %v696_v22, %v688_v21 }
 0x51e   : > { %2130 = vtanh.f32 %v698_v23  ;;  %v793_v40 = vrot.slane %v698_v23, 7 }
 0x52b   : > { %v2131_v24 = vpop.eup %2130 }
 0x52c   : > { %701 = vrot.lane.b32.xlu1 %v2131_v24, %s2260_s12 }
 0x59e   : > { %v702_v25 = vpop.permute.xlu1 %701 }
 0x59f   : > { %v704_v26 = vmul.f32 %v2129_v17, %v702_v25 }
 0x5a1   : > { %v706_v27 = vrot.slane %v704_v26, 1 }
 0x5a3   : > { %707 = vrot.lane.b32.xlu0 %v706_v27, %s2261_s18 }
 0x615   : > { %v2552_v28 = vpop.permute.xlu0 %707 }
 0x616   : > { %2002 = vmatmul.mubr.msk.f32.vlgmr.msra.gmra.mxu1 %vm423_vm9, %v2552_v28 }
 0x617   : > { %2016 = vmatpush3.msra.mxu1 %v2388_v2  ;;  %2023 = vmatprep.mubr.msk.f32.mxu1 %vm2258_vm1, %v2257_v0 }
 0x618   : > { %2017 = vmatprep.subr.mxu1 %v2257_v0 }
 0x619   : > { %2018 = vmatpush3.msra.mxu1 %v2400_v4 }
 0x61a   : > { %2019 = vmatprep.subr.mxu1 %v2257_v0 }
 0x61b   : > { %2020 = vmatpush3.msra.mxu1 %v2413_v6 }
 0x61c   : > { %2021 = vmatprep.subr.mxu1 %v2257_v0 }
 0x61d   : > { %2022 = vmatpush3.msra.mxu1 %v2466_v14 }
 0x61e   : > { %2037 = vmatprep.subr.mxu1 %v2257_v0 }
 0x6d6   : > { %v777_v29 = vpop.f32.mrf.mxu1 }
 0x6d7   : > { %v782_v30 = vrot.slane %v777_v29, 6 }
 0x6d8   : > { %v2003_v31 = vpop.f32.mrf.mxu1 }
 0x6d9   : > { %v784_v32 = vadd.f32 %v782_v30, %v2526_v51 }
 0x6db   : > { %2132 = vtanh.f32 %v784_v32  ;;  %v1887_v34 = vmul.f32 -1.442695, %v784_v32 }
 0x6dd   : > { %2134 = vpow2.f32 %v1887_v34 }
 0x6e8   : > { %v2133_v33 = vpop.eup %2132 }
 0x6e9   : > { %797 = vrot.lane.b32.xlu1 %v2133_v33, %s2260_s12 }
 0x6ea   : > { %v2135_v35 = vpop.eup %2134 }
 0x6eb   : > { %v788_v36 = vadd.f32 1.0, %v2135_v35 }
 0x6ed   : > { %2136 = vrcp.f32 %v788_v36 }
 0x6fa   : > { %v2137_v37 = vpop.eup %2136 }
 0x6fb   : > { %v795_v41 = vmul.f32 %v2137_v37, %v793_v40 }
 0x75b   : > { %v798_v38 = vpop.permute.xlu1 %797 }
 0x75c   : > { %v800_v39 = vmul.f32 %v2137_v37, %v798_v38 }
 0x75e   : > { %802 = vrot.lane.b32.xlu0 %v800_v39, %s2260_s12 }
 0x7d0   : > { %v803_v42 = vpop.permute.xlu0 %802 }
 0x7d1   : > { %v805_v43 = vadd.f32 %v803_v42, %v795_v41 }
 0x7d3   : > { %2138 = vtanh.f32 %v805_v43  ;;  %v900_v61 = vrot.slane %v805_v43, 7 }
 0x7e0   : > { %v2139_v44 = vpop.eup %2138 }
 0x7e1   : > { %808 = vrot.lane.b32.xlu1 %v2139_v44, %s2260_s12 }
 0x853   : > { %v809_v45 = vpop.permute.xlu1 %808 }
 0x854   : > { %v811_v46 = vmul.f32 %v2137_v37, %v809_v45 }
 0x856   : > { %v813_v47 = vrot.slane %v811_v46, 2 }
 0x858   : > { %814 = vrot.lane.b32.xlu0 %v813_v47, %s2261_s18 }
 0x8ca   : > { %v2571_v48 = vpop.permute.xlu0 %814 }
 0x8cb   : > { %2013 = vmatmul.mubr.msk.f32.vlgmr.msra.gmra.mxu0 %vm423_vm9, %v2571_v48 }
 0x8cc   : > { %2027 = vmatpush3.msra.mxu0 %v2388_v2  ;;  %2034 = vmatprep.mubr.msk.f32.mxu0 %vm2258_vm1, %v2257_v0 }
 0x8cd   : > { %2028 = vmatprep.subr.mxu0 %v2257_v0 }
 0x8ce   : > { %2029 = vmatpush3.msra.mxu0 %v2400_v4 }
 0x8cf   : > { %2030 = vmatprep.subr.mxu0 %v2257_v0 }
 0x8d0   : > { %2031 = vmatpush3.msra.mxu0 %v2413_v6 }
 0x8d1   : > { %2032 = vmatprep.subr.mxu0 %v2257_v0 }
 0x8d2   : > { %2033 = vmatpush3.msra.mxu0 %v2466_v14 }
 0x8d3   : > { %2048 = vmatprep.subr.mxu0 %v2257_v0 }
 0x98b   : > { %v884_v49 = vpop.f32.mrf.mxu0 }
 0x98c   : > { %v889_v50 = vrot.slane %v884_v49, 5 }
 0x98d   : > { %v2014_v52 = vpop.f32.mrf.mxu0 }
 0x98e   : > { %v891_v53 = vadd.f32 %v889_v50, %v2526_v51 }
 0x990   : > { %2140 = vtanh.f32 %v891_v53  ;;  %v1889_v55 = vmul.f32 -1.442695, %v891_v53 }
 0x992   : > { %2142 = vpow2.f32 %v1889_v55 }
 0x99d   : > { %v2141_v54 = vpop.eup %2140 }
 0x99e   : > { %904 = vrot.lane.b32.xlu1 %v2141_v54, %s2260_s12 }
 0x99f   : > { %v2143_v56 = vpop.eup %2142 }
 0x9a0   : > { %v895_v57 = vadd.f32 1.0, %v2143_v56 }
 0x9a2   : > { %2144 = vrcp.f32 %v895_v57 }
 0x9af   : > { %v2145_v58 = vpop.eup %2144 }
 0x9b0   : > { %v902_v62 = vmul.f32 %v2145_v58, %v900_v61 }
 0xa10   : > { %v905_v59 = vpop.permute.xlu1 %904 }
 0xa11   : > { %v907_v60 = vmul.f32 %v2145_v58, %v905_v59 }
 0xa13   : > { %909 = vrot.lane.b32.xlu0 %v907_v60, %s2260_s12 }
 0xa85   : > { %v910_v63 = vpop.permute.xlu0 %909 }
 0xa86   : > { %v912_v1 = vadd.f32 %v910_v63, %v902_v62 }
 0xa88   : > { %2146 = vtanh.f32 %v912_v1  ;;  %v1007_v23 = vrot.slane %v912_v1, 7 }
 0xa95   : > { %v2147_v3 = vpop.eup %2146 }
 0xa96   : > { %915 = vrot.lane.b32.xlu1 %v2147_v3, %s2260_s12 }
 0xb08   : > { %v916_v5 = vpop.permute.xlu1 %915 }
 0xb09   : > { %v918_v8 = vmul.f32 %v2145_v58, %v916_v5 }
 0xb0b   : > { %v920_v9 = vrot.slane %v918_v8, 3 }
 0xb0d   : > { %921 = vrot.lane.b32.xlu0 %v920_v9, %s2261_s18 }
 0xb7f   : > { %v2590_v10 = vpop.permute.xlu0 %921 }
 0xb80   : > { %2024 = vmatmul.mubr.msk.f32.vlgmr.msra.gmra.mxu1 %vm423_vm9, %v2590_v10 }
 0xb81   : > { %2038 = vmatpush3.msra.mxu1 %v2388_v2  ;;  %2045 = vmatprep.mubr.msk.f32.mxu1 %vm2258_vm1, %v2257_v0 }
 0xb82   : > { %2039 = vmatprep.subr.mxu1 %v2257_v0 }
 0xb83   : > { %2040 = vmatpush3.msra.mxu1 %v2400_v4 }
 0xb84   : > { %2041 = vmatprep.subr.mxu1 %v2257_v0 }
 0xb85   : > { %2042 = vmatpush3.msra.mxu1 %v2413_v6 }
 0xb86   : > { %2043 = vmatprep.subr.mxu1 %v2257_v0 }
 0xb87   : > { %2044 = vmatpush3.msra.mxu1 %v2466_v14 }
 0xb88   : > { %2059 = vmatprep.subr.mxu1 %v2257_v0 }
 0xc40   : > { %v991_v11 = vpop.f32.mrf.mxu1 }
 0xc41   : > { %v996_v12 = vrot.slane %v991_v11, 4 }
 0xc42   : > { %v2025_v13 = vpop.f32.mrf.mxu1 }
 0xc43   : > { %v998_v15 = vadd.f32 %v996_v12, %v2526_v51 }
 0xc45   : > { %2148 = vtanh.f32 %v998_v15  ;;  %v1891_v17 = vmul.f32 -1.442695, %v998_v15 }
 0xc47   : > { %2150 = vpow2.f32 %v1891_v17 }
 0xc52   : > { %v2149_v16 = vpop.eup %2148 }
 0xc53   : > { %1011 = vrot.lane.b32.xlu1 %v2149_v16, %s2260_s12 }
 0xc54   : > { %v2151_v18 = vpop.eup %2150 }
 0xc55   : > { %v1002_v19 = vadd.f32 1.0, %v2151_v18 }
 0xc57   : > { %2152 = vrcp.f32 %v1002_v19 }
 0xc64   : > { %v2153_v20 = vpop.eup %2152 }
 0xc65   : > { %v1009_v24 = vmul.f32 %v2153_v20, %v1007_v23 }
 0xcc5   : > { %v1012_v21 = vpop.permute.xlu1 %1011 }
 0xcc6   : > { %v1014_v22 = vmul.f32 %v2153_v20, %v1012_v21 }
 0xcc8   : > { %1016 = vrot.lane.b32.xlu0 %v1014_v22, %s2260_s12 }
 0xd3a   : > { %v1017_v25 = vpop.permute.xlu0 %1016 }
 0xd3b   : > { %v1019_v26 = vadd.f32 %v1017_v25, %v1009_v24 }
 0xd3d   : > { %2154 = vtanh.f32 %v1019_v26 }
 0xd4a   : > { %v2155_v27 = vpop.eup %2154 }
 0xd4b   : > { %1022 = vrot.lane.b32.xlu1 %v2155_v27, %s2260_s12 }
 0xdbd   : > { %v1023_v29 = vpop.permute.xlu1 %1022 }
 0xdbe   : > { %v1025_v30 = vmul.f32 %v2153_v20, %v1023_v29 }
 0xdc0   : > { %v1027_v31 = vrot.slane %v1025_v30, 4  ;;  %v1401_v30 = vld [vmem:[%s2824_s5 + $0x18] sm:$0xff] }
 0xdc2   : > { %1028 = vrot.lane.b32.xlu0 %v1027_v31, %s2261_s18  ;;  %v1400_v31 = vld [vmem:[%s2824_s5 + $0x10] sm:$0xff] }
 0xe34   : > { %v2609_v32 = vpop.permute.xlu0 %1028 }
 0xe35   : > { %2035 = vmatmul.mubr.msk.f32.vlgmr.msra.gmra.mxu0 %vm423_vm9, %v2609_v32 }
 0xe36   : > { %2049 = vmatpush3.msra.mxu0 %v2388_v2  ;;  %2056 = vmatprep.mubr.msk.f32.mxu0 %vm2258_vm1, %v2257_v0 }
 0xe37   : > { %2050 = vmatprep.subr.mxu0 %v2257_v0 }
 0xe38   : > { %2051 = vmatpush3.msra.mxu0 %v2400_v4 }
 0xe39   : > { %2052 = vmatprep.subr.mxu0 %v2257_v0 }
 0xe3a   : > { %2053 = vmatpush3.msra.mxu0 %v2413_v6 }
 0xe3b   : > { %2054 = vmatprep.subr.mxu0 %v2257_v0 }
 0xe3c   : > { %2055 = vmatpush3.msra.mxu0 %v2466_v14  ;;  %v1114_v14 = vrot.slane %v1019_v26, 7 }
 0xef5   : > { %v1098_v33 = vpop.f32.mrf.mxu0 }
 0xef6   : > { %v1103_v34 = vrot.slane %v1098_v33, 3  ;;  %v1399_v33 = vld [vmem:[%s2824_s5 + $0x8] sm:$0xff] }
 0xef7   : > { %v2036_v35 = vpop.f32.mrf.mxu0 }
 0xef8   : > { %v1105_v2 = vadd.f32 %v1103_v34, %v2526_v51  ;;  %v1398_v34 = vld [vmem:[%s2824_s5] sm:$0xff] }
 0xefa   : > { %2156 = vtanh.f32 %v1105_v2  ;;  %v1893_v37 = vmul.f32 -1.442695, %v1105_v2 }
 0xefc   : > { %2158 = vpow2.f32 %v1893_v37  ;;  %v1347_v37 = vlaneseq }
 0xf07   : > { %v2157_v36 = vpop.eup %2156 }
 0xf08   : > { %1118 = vrot.lane.b32.xlu1 %v2157_v36, %s2260_s12 }
 0xf09   : > { %v2159_v4 = vpop.eup %2158 }
 0xf0a   : > { %v1109_v38 = vadd.f32 1.0, %v2159_v4  ;;  %v2659_v4 = vand.u32 127, %v1347_v37 }
 0xf0c   : > { %2160 = vrcp.f32 %v1109_v38  ;;  %vm1349_vm10 = vcmp.lt.s32.totalorder %v2659_v4, 16 }
 0xf19   : > { %v2161_v39 = vpop.eup %2160 }
 0xf1a   : > { %v1116_v41 = vmul.f32 %v2161_v39, %v1114_v14 }
 0xf7a   : > { %v1119_v6 = vpop.permute.xlu1 %1118 }
 0xf7b   : > { %v1121_v40 = vmul.f32 %v2161_v39, %v1119_v6  ;;  %v1365_v6 = vsel %vm1349_vm10, %v2590_v10, %v2609_v32 }
 0xf7d   : > { %1123 = vrot.lane.b32.xlu0 %v1121_v40, %s2260_s12  ;;  %v1366_v40 = vsel %vm1349_vm10, %v2609_v32, %v2590_v10 }
 0xfef   : > { %v1124_v42 = vpop.permute.xlu0 %1123 }
 0xff0   : > { %v1126_v43 = vadd.f32 %v1124_v42, %v1116_v41 }
 0xff2   : > { %2162 = vtanh.f32 %v1126_v43  ;;  %v1221_v62 = vrot.slane %v1126_v43, 7 }
 0xfff   : > { %v2163_v44 = vpop.eup %2162 }
0x1000   : > { %1129 = vrot.lane.b32.xlu1 %v2163_v44, %s2260_s12 }
0x1072   : > { %v1130_v45 = vpop.permute.xlu1 %1129 }
0x1073   : > { %v1132_v46 = vmul.f32 %v2161_v39, %v1130_v45  ;;  %v1377_v45 = vrot.slane %v1365_v6, 5 }
0x1075   : > { %v1134_v47 = vrot.slane %v1132_v46, 5 }
0x1077   : > { %1135 = vrot.lane.b32.xlu0 %v1134_v47, %s2261_s18 }
0x10e9   : > { %v2627_v49 = vpop.permute.xlu0 %1135 }
0x10ea   : > { %2046 = vmatmul.mubr.msk.f32.vlgmr.msra.gmra.mxu1 %vm423_vm9, %v2627_v49  ;;  %v1362_v39 = vsel %vm1349_vm10, %v2571_v48, %v2627_v49  ;;  %v1367_v42 = vsel %vm1349_vm10, %v2627_v49, %v2571_v48 }
0x10eb   : > { %2067 = vmatprep.mubr.msk.f32.mxu1 %vm2258_vm1, %v2257_v0  ;;  %2060 = vmatpush3.msra.mxu1 %v1401_v30  ;;  %v1374_v43 = vrot.slane %v1362_v39, 6 }
0x10ec   : > { %2061 = vmatprep.subr.mxu1 %v2257_v0 }
0x10ed   : > { %2062 = vmatpush3.msra.mxu1 %v1400_v31 }
0x10ee   : > { %2063 = vmatprep.subr.mxu1 %v2257_v0 }
0x10ef   : > { %2064 = vmatpush3.msra.mxu1 %v1399_v33 }
0x10f0   : > { %2065 = vmatprep.subr.mxu1 %v2257_v0 }
0x10f1   : > { %2066 = vmatpush3.msra.mxu1 %v1398_v34 }
0x11aa   : > { %v1205_v50 = vpop.f32.mrf.mxu1 }
0x11ab   : > { %v1210_v52 = vrot.slane %v1205_v50, 2  ;;  %v1380_v50 = vrot.slane %v1366_v40, 4 }
0x11ac   : > { %v2047_v53 = vpop.f32.mrf.mxu1 }
0x11ad   : > { %v1212_v54 = vadd.f32 %v1210_v52, %v2526_v51 }
0x11af   : > { %2164 = vtanh.f32 %v1212_v54  ;;  %v1895_v56 = vmul.f32 -1.442695, %v1212_v54  ;;  %v1383_v54 = vrot.slane %v1367_v42, 3 }
0x11b1   : > { %2166 = vpow2.f32 %v1895_v56 }
0x11bc   : > { %v2165_v55 = vpop.eup %2164 }
0x11bd   : > { %1225 = vrot.lane.b32.xlu1 %v2165_v55, %s2260_s12 }
0x11be   : > { %v2167_v57 = vpop.eup %2166 }
0x11bf   : > { %v1216_v58 = vadd.f32 1.0, %v2167_v57  ;;  %v2262_v57 = vmov 1966171168  }
0x11c1   : > { %2168 = vrcp.f32 %v1216_v58  ;;  %v1492_v58 = vunpack.c.l.s4 %v2262_v57 }
0x11ce   : > { %v2169_v59 = vpop.eup %2168 }
0x11cf   : > { %v1223_v63 = vmul.f32 %v2169_v59, %v1221_v62 }
0x122f   : > { %v1226_v60 = vpop.permute.xlu1 %1225 }
0x1230   : > { %v1228_v61 = vmul.f32 %v2169_v59, %v1226_v60  ;;  %v1898_v60 = vld [vmem:[%s2825_s6] ss:$0 sm:$0xff] }
0x1232   : > { %1230 = vrot.lane.b32.xlu0 %v1228_v61, %s2260_s12 }
0x12a4   : > { %v1231_v1 = vpop.permute.xlu0 %1230 }
0x12a5   : > { %v1233_v3 = vadd.f32 %v1231_v1, %v1223_v63 }
0x12a7   : > { %2170 = vtanh.f32 %v1233_v3  ;;  %v1328_v25 = vrot.slane %v1233_v3, 7 }
0x12b4   : > { %v2171_v5 = vpop.eup %2170 }
0x12b5   : > { %1236 = vrot.lane.b32.xlu1 %v2171_v5, %s2260_s12 }
0x1327   : > { %v1237_v8 = vpop.permute.xlu1 %1236 }
0x1328   : > { %v1239_v9 = vmul.f32 %v2169_v59, %v1237_v8  ;;  %v1493_v59 = vunpack.c.0.s8 %v1492_v58  ;;  %v1489_v8 = vld [vmem:[%s2826_s7] sm:$0x1] }
0x132a   : > { %v1241_v11 = vrot.slane %v1239_v9, 6 }
0x132c   : > { %1242 = vrot.lane.b32.xlu0 %v1241_v11, %s2261_s18 }
0x139e   : > { %v1243_v12 = vpop.permute.xlu0 %1242 }
0x139f   : > { %2057 = vmatmul.mubr.msk.f32.vlgmr.msra.gmra.mxu0 %vm423_vm9, %v1243_v12  ;;  %v1359_v38 = vsel %vm1349_vm10, %v2552_v28, %v1243_v12  ;;  %v1368_v46 = vsel %vm1349_vm10, %v1243_v12, %v2552_v28 }
0x13a0   : > { %v1371_v14 = vrot.slane %v1359_v38, 7  ;;  %v1386_v32 = vrot.slane %v1368_v46, 2 }
0x145f   : > { %v1312_v13 = vpop.f32.mrf.mxu0 }
0x1460   : > { %v1317_v15 = vrot.slane %v1312_v13, 1 }
0x1461   : > { %v2058_v16 = vpop.f32.mrf.mxu0 }
0x1462   : > { %v1319_v17 = vadd.f32 %v1317_v15, %v2526_v51 }
0x1464   : > { %2172 = vtanh.f32 %v1319_v17  ;;  %v1897_v19 = vmul.f32 -1.442695, %v1319_v17 }
0x1466   : > { %2174 = vpow2.f32 %v1897_v19 }
0x1471   : > { %v2173_v18 = vpop.eup %2172 }
0x1472   : > { %1332 = vrot.lane.b32.xlu1 %v2173_v18, %s2260_s12  ;;  %v2705_v18 = vld [vmem:[%s2828_s9] sm:$0x1f] }
0x1473   : > { %v2175_v20 = vpop.eup %2174 }
0x1474   : > { %v1323_v21 = vadd.f32 1.0, %v2175_v20 }
0x1476   : > { %2176 = vrcp.f32 %v1323_v21 }
0x1483   : > { %v2177_v22 = vpop.eup %2176 }
0x1484   : > { %v1330_v26 = vmul.f32 %v2177_v22, %v1328_v25 }
0x14e4   : > { %v1333_v23 = vpop.permute.xlu1 %1332 }
0x14e5   : > { %v1335_v24 = vmul.f32 %v2177_v22, %v1333_v23 }
0x14e7   : > { %1337 = vrot.lane.b32.xlu0 %v1335_v24, %s2260_s12 }
0x1559   : > { %v1338_v27 = vpop.permute.xlu0 %1337 }
0x155a   : > { %v1340_v29 = vadd.f32 %v1338_v27, %v1330_v26 }
0x155c   : > { %2178 = vtanh.f32 %v1340_v29 }
0x1569   : > { %v2179_v51 = vpop.eup %2178 }
0x156a   : > { %1343 = vrot.lane.b32.xlu1 %v2179_v51, %s2260_s12  ;;  %s315_s12 = sand.u32 1, %s2246_s19  }
0x156b   : > { %s316_s25 = scalar_lea.vmem [#allocation4], %s315_s12  ;;  %s1814_s16 = scalar_lea.sflag [#allocation5], %s315_s12 }
0x156c   : > { %s1826_s28 = sshll.u32 %s316_s25, 4  ;;  %s1827_s28 = int_to_ptr.vmem [resolvable:$true] %s1826_s28 }
0x156d   : > { %s2192_s11 = scalar_lea.vmem %s1827_s28, 16 }
0x156e   : > { %p2193_p1 = scmp.ne.s32.totalorder %s1827_s28, %s2192_s11 }
0x1570   : > { %p2194_p2 = pnand %p2193_p1, %p2360_p10 }
0x1572   : > { %p2195_p3 = pneg %p2194_p2 }
0x15dc   : > { %v1344_v35 = vpop.permute.xlu1 %1343 }
0x15dd   : > { %v1346_v2 = vmul.f32 %v2177_v22, %v1344_v35 }
0x15df   : > { %v1352_v36 = vrot.slane %v1346_v2, 7 }
0x15e1   : > { %1353 = vrot.lane.b32.xlu0 %v1352_v36, %s2261_s18  ;;  %s1907_s18 = sshll.u32 %s2343_s21, 4  ;;  %s2263_s21 = smov [#allocation4]  }
0x15e2   : > { %s2784_s22 = scalar_lea.hbm %s2829_s10, %s1907_s18  ;;  %s2196_s26 = sshll.u32 %s2263_s21, 4  ;;  %s2197_s26 = int_to_ptr.vmem [resolvable:$false] %s2196_s26 }
0x15e3   : > { %s2198_s13 = scalar_lea.vmem %s2197_s26, 32  ;;  %p2199_p4 = scmp.lt.s32.totalorder %s1827_s28, %s2197_s26 }
0x15e4   : > { %p2200_p5 = scmp.lt.s32.totalorder %s2198_s13, %s2192_s11 }
0x15e6   : > { %p2201_p6 = por %p2200_p5, %p2199_p4 }
0x15e8   : > { %p2202_p7 = pnand %p2201_p6, %p2195_p3 }
0x1653   : > { %v1354_v41 = vpop.permute.xlu0 %1353 }
0x1654   : > { %v1356_v44 = vsel %vm1349_vm10, %v2533_v7, %v1354_v41  ;;  %v1369_v52 = vsel %vm1349_vm10, %v1354_v41, %v2533_v7  ;;  %v2682_v7 = vshrl.u32 %v1347_v37, 7 }
0x1655   : > { %v1391_v47 = vsel %vm370_vm0, %v1356_v44, %v1371_v14  ;;  %v1389_v48 = vrot.slane %v1369_v52, 1 }
0x1656   : > { %v1392_v53 = vsel %vm372_vm2, %v1391_v47, %v1374_v43  ;;  %v1496_v61 = vsub.s32 %v1493_v59, %v2682_v7  ;;  %vm1485_vm11 = vcmp.eq.s32.totalorder %v2682_v7, %v2659_v4  ;;  %v1511_v11 = vsub.s32 0, %v2682_v7 }
0x1657   : > { %v1393_v10 = vsel %vm374_vm3, %v1392_v53, %v1377_v45  ;;  %v2698_v13 = vsel %vm1485_vm11, 1.0, %v2257_v0  ;;  %v2709_v0 = vsub.s32 4, %v2682_v7  ;;  %v1549_v37 = vsub.s32 2, %v2682_v7 }
0x1658   : > { %v1394_v55 = vsel %vm376_vm4, %v1393_v10, %v1380_v50  ;;  %v1585_v57 = vsub.s32 3, %v2682_v7 }
0x1659   : > { %v1395_v49 = vsel %vm378_vm5, %v1394_v55, %v1383_v54 }
0x165a   : > { %v1396_v56 = vsel %vm380_vm6, %v1395_v49, %v1386_v32 }
0x165b   : > { %v1397_v28 = vsel %vm382_vm7, %v1396_v56, %v1389_v48 }
0x165c   : > { %2068 = vmatmul.mubr.msk.f32.vlgmr.msra.gmra.mxu1 %vm423_vm9, %v1397_v28 }
0x171c   : > { %v1478_v62 = vpop.f32.mrf.mxu1 }
0x171d   : > { %v2688_v63 = vadd.f32 %v1898_v60, %v1478_v62 }
0x171e   : > { %v2069_v1 = vpop.f32.mrf.mxu1 }
0x171f   : > { %v1497_v3 = vrot.slane %v2688_v63, %v1496_v61 }
0x1721   : > { %v1498_v5 = vcombine.high %v1497_v3, %v1497_v3 }
0x1723   : > { %v1505_v9 = vrot.slane %v1498_v5, %v1496_v61 }
0x1725   : > { %v1507_v12 = vadd.f32 %v1505_v9, %v1489_v8 }
0x1727   : > { %v1512_v15 = vrot.slane %v1507_v12, %v1511_v11 }
0x1729   : > { %v1514_v16 = vmul.f32 %v2698_v13, %v1512_v15 }
0x172b   : > { %v1516_v17 = vsel %vm1515_vm12, %v1514_v16, 0.0 }
0x172c   : > { %1517 = vadd.xlane.f32.xlu1 %v1516_v17 }
0x17b5   : > { %v1518_v19 = vpop.xlane.xlu1 %1517 }
0x17b6   : > { %v1519_v20 = vadd.f32 %v1518_v19, %v2705_v18 }
0x17b8   : > { %v1521_v21 = vand.u32 2147483647, %v1519_v20  ;;  %vm1522_vm13 = vcmp.lt.s32.totalorder %v1519_v20, 0 }
0x17ba   : > { %v1523_v22 = vsub.s32 0, %v1521_v21 }
0x17bc   : > { %v1524_v23 = vsel %vm1522_vm13, %v1523_v22, %v1521_v21 }
0x17bd   : > { %v1525_v24 = vand.u32 4294967288, %v1524_v23 }
0x17bf   : > { %v1526_v25 = vor.u32 %v1525_v24, %v2709_v0 }
0x17c1   : > { %v1527_v26 = vsel %vm1515_vm12, %v1526_v25, 2147483648 }
0x17c2   : > { %v1528_v27 = vrot.slane %v1527_v26, 4 }
0x17c4   : > { %vm1529_vm14 = vcmp.gt.s32.totalorder %v1527_v26, %v1528_v27 }
0x17c5   : > { %v1530_v29 = vsel %vm1529_vm14, %v1527_v26, %v1528_v27 }
0x17c6   : > { %v1531_v51 = vrot.slane %v1530_v29, 2 }
0x17c8   : > { %vm1532_vm15 = vcmp.gt.s32.totalorder %v1530_v29, %v1531_v51 }
0x17c9   : > { %v1533_v30 = vsel %vm1532_vm15, %v1530_v29, %v1531_v51 }
0x17ca   : > { %v1534_v31 = vrot.slane %v1533_v30, 1 }
0x17cc   : > { %vm1535_vm0 = vcmp.gt.s32.totalorder %v1533_v30, %v1534_v31 }
0x17cd   : > { %v2713_v33 = vsel %vm1535_vm0, %v1533_v30, %v1534_v31 }
0x17ce   : > { %v1539_v34 = vand.u32 4294967288, %v2713_v33 }
0x17d0   : > { %v1541_v35 = vsub.s32 0, %v1539_v34  ;;  %vm1540_vm1 = vcmp.lt.s32.totalorder %v1539_v34, 0 }
0x17d2   : > { %v1901_v2 = vmin.u32 %v1541_v35, %v1539_v34 }
0x17d4   : > { %v1543_v36 = vor.u32 2147483648, %v1901_v2 }
0x17d6   : > { %v1544_v38 = vsel %vm1540_vm1, %v1543_v36, %v1539_v34 }
0x17d7   : > { %v1546_v39 = vadd.f32 %v1544_v38, %v2688_v63 }
0x17d9   : > { %v1550_v6 = vrot.slane %v1546_v39, %v1549_v37 }
0x17db   : > { %v1551_v40 = vmul.f32 %v2698_v13, %v1550_v6 }
0x17dd   : > { %v1552_v14 = vsel %vm1515_vm12, %v1551_v40, 0.0 }
0x17de   : > { %1553 = vadd.xlane.f32.xlu0 %v1552_v14 }
0x1867   : > { %v1554_v41 = vpop.xlane.xlu0 %1553 }
0x1868   : > { %v1555_v42 = vadd.f32 %v1554_v41, %v2705_v18 }
0x186a   : > { %v1557_v43 = vand.u32 2147483647, %v1555_v42  ;;  %vm1558_vm2 = vcmp.lt.s32.totalorder %v1555_v42, 0 }
0x186c   : > { %v1559_v44 = vsub.s32 0, %v1557_v43 }
0x186e   : > { %v1560_v45 = vsel %vm1558_vm2, %v1559_v44, %v1557_v43 }
0x186f   : > { %v1561_v46 = vand.u32 4294967288, %v1560_v45 }
0x1871   : > { %v1562_v47 = vor.u32 %v1561_v46, %v2709_v0 }
0x1873   : > { %v1563_v50 = vsel %vm1515_vm12, %v1562_v47, 2147483648 }
0x1874   : > { %v1564_v52 = vrot.slane %v1563_v50, 4 }
0x1876   : > { %vm1565_vm3 = vcmp.gt.s32.totalorder %v1563_v50, %v1564_v52 }
0x1877   : > { %v1566_v53 = vsel %vm1565_vm3, %v1563_v50, %v1564_v52  ;;  %v1657_v52 = vsub.s32 5, %v2682_v7 }
0x1878   : > { %v1567_v54 = vrot.slane %v1566_v53, 2 }
0x187a   : > { %vm1568_vm4 = vcmp.gt.s32.totalorder %v1566_v53, %v1567_v54 }
0x187b   : > { %v1569_v10 = vsel %vm1568_vm4, %v1566_v53, %v1567_v54 }
0x187c   : > { %v1570_v32 = vrot.slane %v1569_v10, 1 }
0x187e   : > { %vm1571_vm5 = vcmp.gt.s32.totalorder %v1569_v10, %v1570_v32 }
0x187f   : > { %v2723_v55 = vsel %vm1571_vm5, %v1569_v10, %v1570_v32 }
0x1880   : > { %v1575_v48 = vand.u32 4294967288, %v2723_v55 }
0x1882   : > { %v1577_v49 = vsub.s32 0, %v1575_v48  ;;  %vm1576_vm6 = vcmp.lt.s32.totalorder %v1575_v48, 0 }
0x1884   : > { %v1902_v56 = vmin.u32 %v1577_v49, %v1575_v48 }
0x1886   : > { %v1579_v28 = vor.u32 2147483648, %v1902_v56 }
0x1888   : > { %v1580_v58 = vsel %vm1576_vm6, %v1579_v28, %v1575_v48 }
0x1889   : > { %v1582_v59 = vadd.f32 %v1580_v58, %v2688_v63 }
0x188b   : > { %v1586_v60 = vrot.slane %v1582_v59, %v1585_v57 }
0x188d   : > { %v1587_v61 = vmul.f32 %v2698_v13, %v1586_v60 }
0x188f   : > { %v1588_v62 = vsel %vm1515_vm12, %v1587_v61, 0.0 }
0x1890   : > { %1589 = vadd.xlane.f32.xlu0 %v1588_v62 }
0x1919   : > { %v1590_v1 = vpop.xlane.xlu0 %1589 }
0x191a   : > { %v1591_v3 = vadd.f32 %v1590_v1, %v2705_v18 }
0x191c   : > { %v1593_v5 = vand.u32 2147483647, %v1591_v3  ;;  %vm1594_vm7 = vcmp.lt.s32.totalorder %v1591_v3, 0 }
0x191e   : > { %v1595_v8 = vsub.s32 0, %v1593_v5 }
0x1920   : > { %v1596_v9 = vsel %vm1594_vm7, %v1595_v8, %v1593_v5  ;;  %vm1707_vm7 = vcmask 38918  }
0x1921   : > { %v1597_v11 = vand.u32 4294967288, %v1596_v9 }
0x1923   : > { %v1598_v12 = vor.u32 %v1597_v11, %v2709_v0 }
0x1925   : > { %v1599_v15 = vsel %vm1515_vm12, %v1598_v12, 2147483648 }
0x1926   : > { %v1600_v16 = vrot.slane %v1599_v15, 4 }
0x1928   : > { %vm1601_vm8 = vcmp.gt.s32.totalorder %v1599_v15, %v1600_v16 }
0x1929   : > { %v1602_v17 = vsel %vm1601_vm8, %v1599_v15, %v1600_v16 }
0x192a   : > { %v1603_v19 = vrot.slane %v1602_v17, 2 }
0x192c   : > { %vm1604_vm9 = vcmp.gt.s32.totalorder %v1602_v17, %v1603_v19 }
0x192d   : > { %v1605_v20 = vsel %vm1604_vm9, %v1602_v17, %v1603_v19 }
0x192e   : > { %v1606_v21 = vrot.slane %v1605_v20, 1 }
0x1930   : > { %vm1607_vm10 = vcmp.gt.s32.totalorder %v1605_v20, %v1606_v21 }
0x1931   : > { %v2733_v22 = vsel %vm1607_vm10, %v1605_v20, %v1606_v21  ;;  %v1705_v20 = vsub.s32 4, %v2659_v4  ;;  %vm1725_vm10 = vcmp.eq.s32.totalorder %v2659_v4, 5 }
0x1932   : > { %v1611_v23 = vand.u32 4294967288, %v2733_v22 }
0x1934   : > { %v1613_v24 = vsub.s32 0, %v1611_v23  ;;  %vm1612_vm11 = vcmp.lt.s32.totalorder %v1611_v23, 0 }
0x1936   : > { %v1903_v25 = vmin.u32 %v1613_v24, %v1611_v23 }
0x1938   : > { %v1615_v26 = vor.u32 2147483648, %v1903_v25 }
0x193a   : > { %v1616_v27 = vsel %vm1612_vm11, %v1615_v26, %v1611_v23  ;;  %vm1742_vm11 = vcmp.eq.s32.totalorder %v2659_v4, 4 }
0x193b   : > { %v1618_v29 = vadd.f32 %v1616_v27, %v2688_v63 }
0x193d   : > { %v1622_v51 = vrot.slane %v1618_v29, %v2709_v0 }
0x193f   : > { %v1623_v30 = vmul.f32 %v2698_v13, %v1622_v51 }
0x1941   : > { %v1624_v31 = vsel %vm1515_vm12, %v1623_v30, 0.0 }
0x1942   : > { %1625 = vadd.xlane.f32.xlu1 %v1624_v31 }
0x19cb   : > { %v1626_v34 = vpop.xlane.xlu1 %1625 }
0x19cc   : > { %v1627_v35 = vadd.f32 %v1626_v34, %v2705_v18 }
0x19ce   : > { %v1629_v2 = vand.u32 2147483647, %v1627_v35  ;;  %vm1630_vm13 = vcmp.lt.s32.totalorder %v1627_v35, 0 }
0x19d0   : > { %v1631_v36 = vsub.s32 0, %v1629_v2 }
0x19d2   : > { %v1632_v37 = vsel %vm1630_vm13, %v1631_v36, %v1629_v2 }
0x19d3   : > { %v1633_v38 = vand.u32 4294967288, %v1632_v37 }
0x19d5   : > { %v1634_v39 = vor.u32 %v1633_v38, %v2709_v0 }
0x19d7   : > { %v1635_v6 = vsel %vm1515_vm12, %v1634_v39, 2147483648 }
0x19d8   : > { %v1636_v40 = vrot.slane %v1635_v6, 4 }
0x19da   : > { %vm1637_vm14 = vcmp.gt.s32.totalorder %v1635_v6, %v1636_v40 }
0x19db   : > { %v1638_v14 = vsel %vm1637_vm14, %v1635_v6, %v1636_v40  ;;  %vm1759_vm14 = vcmp.eq.s32.totalorder %v2659_v4, 3 }
0x19dc   : > { %v1639_v41 = vrot.slane %v1638_v14, 2 }
0x19de   : > { %vm1640_vm15 = vcmp.gt.s32.totalorder %v1638_v14, %v1639_v41 }
0x19df   : > { %v1641_v42 = vsel %vm1640_vm15, %v1638_v14, %v1639_v41 }
0x19e0   : > { %v1642_v43 = vrot.slane %v1641_v42, 1 }
0x19e2   : > { %vm1643_vm0 = vcmp.gt.s32.totalorder %v1641_v42, %v1642_v43 }
0x19e3   : > { %v2743_v44 = vsel %vm1643_vm0, %v1641_v42, %v1642_v43  ;;  %vm1776_vm0 = vcmp.eq.s32.totalorder %v2659_v4, 2 }
0x19e4   : > { %v1647_v45 = vand.u32 4294967288, %v2743_v44 }
0x19e6   : > { %v1649_v46 = vsub.s32 0, %v1647_v45  ;;  %vm1648_vm1 = vcmp.lt.s32.totalorder %v1647_v45, 0 }
0x19e8   : > { %v1904_v47 = vmin.u32 %v1649_v46, %v1647_v45 }
0x19ea   : > { %v1651_v50 = vor.u32 2147483648, %v1904_v47 }
0x19ec   : > { %v1652_v53 = vsel %vm1648_vm1, %v1651_v50, %v1647_v45 }
0x19ed   : > { %v1654_v54 = vadd.f32 %v1652_v53, %v2688_v63 }
0x19ef   : > { %v1658_v10 = vrot.slane %v1654_v54, %v1657_v52  ;;  %v1645_v52 = vand.u32 7, %v2743_v44 }
0x19f1   : > { %v1659_v32 = vmul.f32 %v2698_v13, %v1658_v10 }
0x19f3   : > { %v1660_v48 = vsel %vm1515_vm12, %v1659_v32, 0.0 }
0x19f4   : > { %1661 = vadd.xlane.f32.xlu0 %v1660_v48  ;;  %v1646_v48 = vsub.s32 4, %v1645_v52 }
0x1a7d   : > { %v1662_v49 = vpop.xlane.xlu0 %1661 }
0x1a7e   : > { %v1663_v56 = vadd.f32 %v1662_v49, %v2705_v18 }
0x1a80   : > { %v1665_v28 = vand.u32 2147483647, %v1663_v56  ;;  %vm1666_vm2 = vcmp.lt.s32.totalorder %v1663_v56, 0 }
0x1a82   : > { %v1667_v57 = vsub.s32 0, %v1665_v28 }
0x1a84   : > { %v1668_v58 = vsel %vm1666_vm2, %v1667_v57, %v1665_v28  ;;  %vm1793_vm2 = vcmp.eq.s32.totalorder %v2659_v4, 1 }
0x1a85   : > { %v1669_v59 = vand.u32 4294967288, %v1668_v58 }
0x1a87   : > { %v1670_v60 = vor.u32 %v1669_v59, %v2709_v0  ;;  %v1906_v0 = vld [vmem:[%s2827_s8] ss:$0 sm:$0xff] }
0x1a89   : > { %v1671_v7 = vsel %vm1515_vm12, %v1670_v60, 2147483648 }
0x1a8a   : > { %v1672_v61 = vrot.slane %v1671_v7, 4 }
0x1a8c   : > { %vm1673_vm3 = vcmp.gt.s32.totalorder %v1671_v7, %v1672_v61 }
0x1a8d   : > { %v1674_v62 = vsel %vm1673_vm3, %v1671_v7, %v1672_v61 }
0x1a8e   : > { %v1675_v1 = vrot.slane %v1674_v62, 2 }
0x1a90   : > { %vm1676_vm4 = vcmp.gt.s32.totalorder %v1674_v62, %v1675_v1 }
0x1a91   : > { %v1677_v13 = vsel %vm1676_vm4, %v1674_v62, %v1675_v1  ;;  %v1609_v62 = vand.u32 7, %v2733_v22  ;;  %vm1810_vm4 = vcmp.eq.s32.totalorder %v2659_v4, 0 }
0x1a92   : > { %v1678_v3 = vrot.slane %v1677_v13, 1 }
0x1a94   : > { %vm1679_vm5 = vcmp.gt.s32.totalorder %v1677_v13, %v1678_v3 }
0x1a95   : > { %v1680_v5 = vsel %vm1679_vm5, %v1677_v13, %v1678_v3 }
0x1a96   : > { %v1683_v8 = vand.u32 4294967288, %v1680_v5  ;;  %v1681_v37 = vand.u32 7, %v1680_v5  ;;  %v1610_v5 = vsub.s32 4, %v1609_v62 }
0x1a98   : > { %v1685_v18 = vsub.s32 0, %v1683_v8  ;;  %vm1684_vm6 = vcmp.lt.s32.totalorder %v1683_v8, 0  ;;  %v1682_v6 = vsub.s32 4, %v1681_v37 }
0x1a9a   : > { %v1905_v9 = vmin.u32 %v1685_v18, %v1683_v8 }
0x1a9c   : > { %v1687_v11 = vor.u32 2147483648, %v1905_v9 }
0x1a9e   : > { %v1688_v12 = vsel %vm1684_vm6, %v1687_v11, %v1683_v8 }
0x1a9f   : > { %v1690_v15 = vadd.f32 %v1688_v12, %v2688_v63 }
0x1aa1   : > { %v1698_v16 = vadd.f32 %v1906_v0, %v1690_v15 }
0x1aa3   : > { %v1700_v17 = vand.u32 2147483647, %v1698_v16  ;;  %vm1701_vm12 = vcmp.lt.s32.totalorder %v1698_v16, 0 }
0x1aa5   : > { %v1702_v19 = vsub.s32 0, %v1700_v17 }
0x1aa7   : > { %v1703_v21 = vsel %vm1701_vm12, %v1702_v19, %v1700_v17  ;;  %v1573_v19 = vand.u32 7, %v2723_v55 }
0x1aa8   : > { %v1704_v23 = vand.u32 4294967288, %v1703_v21 }
0x1aaa   : > { %v1706_v24 = vor.u32 %v1705_v20, %v1704_v23 }
0x1aac   : > { %v1708_v25 = vsel %vm1707_vm7, %v1706_v24, 2147483648  ;;  %v1574_v24 = vsub.s32 4, %v1573_v19 }
0x1aad   : > { %v1710_v26 = vshra.s32 %v1708_v25, 16  ;;  %v1709_v29 = vand.u32 65535, %v1708_v25 }
0x1aaf   : > { %v1712_v27 = vcvt.s32.f32 %v1710_v26  ;;  %v1711_v30 = vcvt.s32.f32 %v1709_v29 }
0x1ab1   : > { %1713 = vmax.xlane.f32.xlu1 %v1712_v27 }
0x1b3a   : > { %v1714_v51 = vpop.xlane.xlu1 %1713 }
0x1b3b   : > { %vm1715_vm8 = vcmp.eq.f32.partialorder %v1712_v27, %v1714_v51  ;;  %v1720_v31 = vcvt.f32.s32 %v1714_v51 }
0x1b3c   : > { %v1716_v63 = vsel %vm1715_vm8, %v1711_v30, -inf }
0x1b3d   : > { %1717 = vmax.xlane.f32.xlu0 %v1716_v63  ;;  %v1721_v35 = vshll.u32 %v1720_v31, 16 }
0x1bc6   : > { %v1718_v34 = vpop.xlane.xlu0 %1717 }
0x1bc7   : > { %v1719_v2 = vcvt.f32.s32 %v1718_v34 }
0x1bc9   : > { %v1722_v36 = vadd.s32 %v1721_v35, %v1719_v2  ;;  %v1537_v35 = vand.u32 7, %v2713_v33 }
0x1bcb   : > { %v1723_v38 = vand.u32 7, %v1722_v36 }
0x1bcd   : > { %v1724_v39 = vsub.s32 4, %v1723_v38  ;;  %v1538_v38 = vsub.s32 4, %v1537_v35 }
0x1bcf   : > { %vm1727_vm9 = vcmp.eq.s32.totalorder %v2659_v4, %v1724_v39  ;;  %v1726_v32 = vsel %vm1725_vm10, %v1724_v39, 0 }
0x1bd0   : > { %v1728_v40 = vsel %vm1727_vm9, %v1682_v6, 0 }
0x1bd1   : > { %v1729_v14 = vsel %vm1707_vm7, %v1728_v40, 0 }
0x1bd2   : > { %v1731_v41 = vshrl.u32 %v1729_v14, 16  ;;  %v1730_v42 = vand.u32 65535, %v1729_v14 }
0x1bd4   : > { %v1733_v43 = vcvt.s32.f32 %v1731_v41  ;;  %v1732_v45 = vcvt.s32.f32 %v1730_v42 }
0x1bd6   : > { %1736 = vadd.xlane.f32.xlu1 %v1733_v43  ;;  %1734 = vadd.xlane.f32.xlu0 %v1732_v45 }
0x1c5f   : > { %v1737_v46 = vpop.xlane.xlu1 %1736  ;;  %v1735_v47 = vpop.xlane.xlu0 %1734 }
0x1c60   : > { %v1739_v50 = vcvt.f32.s32 %v1737_v46  ;;  %v1738_v54 = vcvt.f32.s32 %v1735_v47 }
0x1c62   : > { %v1740_v53 = vshll.u32 %v1739_v50, 16 }
0x1c64   : > { %v1741_v10 = vadd.s32 %v1740_v53, %v1738_v54 }
0x1c66   : > { %v1743_v49 = vsel %vm1742_vm11, %v1741_v10, %v1726_v32  ;;  %vm1744_vm13 = vcmp.eq.s32.totalorder %v2659_v4, %v1741_v10 }
0x1c67   : > { %v1745_v56 = vsel %vm1744_vm13, %v1646_v48, 0 }
0x1c68   : > { %v1746_v28 = vsel %vm1707_vm7, %v1745_v56, 0 }
0x1c69   : > { %v1748_v57 = vshrl.u32 %v1746_v28, 16  ;;  %v1747_v58 = vand.u32 65535, %v1746_v28 }
0x1c6b   : > { %v1750_v59 = vcvt.s32.f32 %v1748_v57  ;;  %v1749_v60 = vcvt.s32.f32 %v1747_v58 }
0x1c6d   : > { %1753 = vadd.xlane.f32.xlu1 %v1750_v59  ;;  %1751 = vadd.xlane.f32.xlu0 %v1749_v60 }
0x1cf6   : > { %v1754_v44 = vpop.xlane.xlu1 %1753  ;;  %v1752_v7 = vpop.xlane.xlu0 %1751 }
0x1cf7   : > { %v1756_v61 = vcvt.f32.s32 %v1754_v44  ;;  %v1755_v13 = vcvt.f32.s32 %v1752_v7 }
0x1cf9   : > { %v1757_v1 = vshll.u32 %v1756_v61, 16 }
0x1cfb   : > { %v1758_v3 = vadd.s32 %v1757_v1, %v1755_v13 }
0x1cfd   : > { %v1760_v8 = vsel %vm1759_vm14, %v1758_v3, %v1743_v49  ;;  %vm1761_vm15 = vcmp.eq.s32.totalorder %v2659_v4, %v1758_v3 }
0x1cfe   : > { %v1762_v18 = vsel %vm1761_vm15, %v1610_v5, 0 }
0x1cff   : > { %v1763_v9 = vsel %vm1707_vm7, %v1762_v18, 0 }
0x1d00   : > { %v1765_v11 = vshrl.u32 %v1763_v9, 16  ;;  %v1764_v12 = vand.u32 65535, %v1763_v9 }
0x1d02   : > { %v1767_v0 = vcvt.s32.f32 %v1765_v11  ;;  %v1766_v15 = vcvt.s32.f32 %v1764_v12 }
0x1d04   : > { %1770 = vadd.xlane.f32.xlu1 %v1767_v0  ;;  %1768 = vadd.xlane.f32.xlu0 %v1766_v15 }
0x1d8d   : > { %v1771_v16 = vpop.xlane.xlu1 %1770  ;;  %v1769_v22 = vpop.xlane.xlu0 %1768 }
0x1d8e   : > { %v1773_v17 = vcvt.f32.s32 %v1771_v16  ;;  %v1772_v21 = vcvt.f32.s32 %v1769_v22 }
0x1d90   : > { %v1774_v20 = vshll.u32 %v1773_v17, 16 }
0x1d92   : > { %v1775_v23 = vadd.s32 %v1774_v20, %v1772_v21 }
0x1d94   : > { %v1777_v25 = vsel %vm1776_vm0, %v1775_v23, %v1760_v8  ;;  %vm1778_vm1 = vcmp.eq.s32.totalorder %v2659_v4, %v1775_v23 }
0x1d95   : > { %v1779_v26 = vsel %vm1778_vm1, %v1574_v24, 0 }
0x1d96   : > { %v1780_v27 = vsel %vm1707_vm7, %v1779_v26, 0 }
0x1d97   : > { %v1782_v29 = vshrl.u32 %v1780_v27, 16  ;;  %v1781_v51 = vand.u32 65535, %v1780_v27 }
0x1d99   : > { %v1784_v30 = vcvt.s32.f32 %v1782_v29  ;;  %v1783_v63 = vcvt.s32.f32 %v1781_v51 }
0x1d9b   : > { %1787 = vadd.xlane.f32.xlu1 %v1784_v30  ;;  %1785 = vadd.xlane.f32.xlu0 %v1783_v63 }
0x1e24   : > { %v1788_v31 = vpop.xlane.xlu1 %1787  ;;  %v1786_v55 = vpop.xlane.xlu0 %1785 }
0x1e25   : > { %v1790_v34 = vcvt.f32.s32 %v1788_v31  ;;  %v1789_v36 = vcvt.f32.s32 %v1786_v55 }
0x1e27   : > { %v1791_v2 = vshll.u32 %v1790_v34, 16 }
0x1e29   : > { %v1792_v37 = vadd.s32 %v1791_v2, %v1789_v36 }
0x1e2b   : > { %vm1795_vm3 = vcmp.eq.s32.totalorder %v2659_v4, %v1792_v37  ;;  %v1794_v39 = vsel %vm1793_vm2, %v1792_v37, %v1777_v25 }
0x1e2c   : > { %v1796_v6 = vsel %vm1795_vm3, %v1538_v38, 0 }
0x1e2d   : > { %v1797_v40 = vsel %vm1707_vm7, %v1796_v6, 0 }
0x1e2e   : > { %v1799_v14 = vshrl.u32 %v1797_v40, 16  ;;  %v1798_v41 = vand.u32 65535, %v1797_v40 }
0x1e30   : > { %v1801_v42 = vcvt.s32.f32 %v1799_v14  ;;  %v1800_v43 = vcvt.s32.f32 %v1798_v41 }
0x1e32   : > { %1804 = vadd.xlane.f32.xlu1 %v1801_v42  ;;  %1802 = vadd.xlane.f32.xlu0 %v1800_v43 }
0x1ebb   : > { %v1805_v33 = vpop.xlane.xlu1 %1804  ;;  %v1803_v45 = vpop.xlane.xlu0 %1802 }
0x1ebc   : > { %v1807_v46 = vcvt.f32.s32 %v1805_v33  ;;  %v1806_v50 = vcvt.f32.s32 %v1803_v45 }
0x1ebe   : > { %v1808_v47 = vshll.u32 %v1807_v46, 16 }
0x1ec0   : > { %v1809_v52 = vadd.s32 %v1808_v47, %v1806_v50 }
0x1ec2   : > { %v1811_v53 = vsel %vm1810_vm4, %v1809_v52, %v1794_v39 }
0x1ec3   : > { %1812 = vst [vmem:[%s316_s25 - $0x6] sm:$0x40] %v1811_v53 }
0x1ec4   : > { %2205 = shalt.err (!%p2202_p7)
}
0x1ec5   : > { %s2206_s0 = scalar_lea.hbm %s2784_s22, 16  ;;  %s2210_s17 = scalar_lea.hbm %s2829_s10, 64 }
0x1ec6   : > { %p2207_p8 = scmp.ne.s32.totalorder %s2784_s22, %s2206_s0  ;;  %p2211_p13 = scmp.lt.s32.totalorder %s2784_s22, %s2829_s10 }
0x1ec7   : > { %p2212_p0 = scmp.lt.s32.totalorder %s2210_s17, %s2206_s0 }
0x1ec8   : > { %p2208_p9 = pnand %p2207_p8, %p2360_p10 }
0x1ec9   : > { %p2213_p1 = por %p2212_p0, %p2211_p13 }
0x1eca   : > { %p2209_p12 = pneg %p2208_p9 }
0x1ecc   : > { %p2214_p2 = pnand %p2213_p1, %p2209_p12 }
0x1ece   : > { %2217 = shalt.err (!%p2214_p2)
}
0x1ecf   : > { %2070 = dma.vmem_to_hbm [thread:$0]  (%p2360_p10), %s1827_s28, 16, %s2784_s22, %s1814_s16  }
0x1ed0 PF: > { %s2844_s29 = sld [smem:[#allocation10_spill]] }
0x1ed1   : > { %s2845_s12 = sld [smem:[#allocation8_spill]] }
0x1ed6   : > { %p2076_p3 = scmp.ge.s32.totalorder %s2844_s29, 2 }
0x1ed7   : > { %s1838_s25 = sand.u32 1, %s2845_s12  }
0x1ed8   : > { %p2073_p4 = pnand %p2076_p3, %p2364_p11  ;;  %s1839_s20 = scalar_lea.sflag [#allocation5], %s1838_s25 }
0x1eda   : > { %p2074_p5 = pneg %p2073_p4 }
0x1edc   : > { %2237 = dma.done.wait (%p2074_p5), %s1839_s20, 16  }
0x1edd   : > { %2239 = vsyncadd (%p2074_p5), %s1839_s20, 4294967280  ;;  %s2847_s20 = sld [smem:[#allocation11_spill]]  ;;  %s2850_s18 = smov %s2246_s19 }
0x1ede   : > { %s2848_s15 = sld [smem:[#allocation9_spill]] }
0x1edf   : > { %s2849_s0 = sld [smem:[#allocation12_spill]] }
0x1ee3   : > { %p26_p6 = scmp.ge.s32.totalorder %s2847_s20, 6  }
0x1ee4   : > { %s2851_s19 = smov %s2848_s15 }
0x1ee5   :  { %28 = sbr.rel (!%p26_p6) target bundleno = 18 (0x12), region = 96 }
0x1eea   :  { %1843 = vsyncpa [#allocation5], 1 }
0x1eeb   :  { %1845 = vsyncpa [#allocation5 + $0x1], 1 }

</bundles_post_ra>
